<compile_context>
chip_gen: v5e
topology: v5e:2x2
jax: 0.10.0
libtpu: 0.0.40
codegen_flags: <defaults>
</compile_context>

<pallas_src>
import functools

import jax
import jax.numpy as jnp
from jax import lax
from jax.experimental import pallas as pl
from jax.experimental.pallas import tpu as pltpu


def attn_prop_kernel(
    x_ref, s_ref,
    wq_ref, bq_ref, wk_ref, bk_ref, wv_ref, bv_ref,
    wm_ref, bm_ref,
    w1x_ref, w1m_ref, b1_ref, bns_ref, bnb_ref,
    w2_ref, b2_ref,
    o_ref,
    k_sc, v_sc,
    *, num_heads, head_dim, scaling,
):
    # --- K/V projections: once per batch (first N-tile), kept resident in VMEM.
    @pl.when(pl.program_id(1) == 0)
    def _():
        sb = s_ref[0]  # (M, D) bf16
        k = jnp.dot(sb, wk_ref[...], preferred_element_type=jnp.float32) + bk_ref[...]
        v = jnp.dot(sb, wv_ref[...], preferred_element_type=jnp.float32) + bv_ref[...]
        k_sc[...] = k.astype(jnp.bfloat16)
        v_sc[...] = v.astype(jnp.bfloat16)

    xb = x_ref[0]  # (TN, D) bf16

    # Q projection; fold 1/sqrt(head_dim) into q (one (TN, D) multiply instead
    # of H (TN, M) multiplies on the scores).
    inv_sqrt_dim = 1.0 / (head_dim ** 0.5)
    q = jnp.dot(xb, wq_ref[...], preferred_element_type=jnp.float32) + bq_ref[...]
    q = (q * inv_sqrt_dim).astype(jnp.bfloat16)

    tn = q.shape[0]
    d_model = num_heads * head_dim

    # Per-head attention with the merge Conv1d fused in (no lane concat).
    mm = jnp.zeros((tn, d_model), jnp.float32)
    for hh in range(num_heads):  # static, small loop over heads
        lo = hh * head_dim
        qh = q[:, lo:lo + head_dim]        # (TN, dh) bf16
        kh = k_sc[:, lo:lo + head_dim]     # (M, dh)  bf16
        vh = v_sc[:, lo:lo + head_dim]     # (M, dh)  bf16
        # scores = qh @ kh^T without an explicit transpose: contract dim 1 of both.
        sc = lax.dot_general(qh, kh, (((1,), (1,)), ((), ())),
                             preferred_element_type=jnp.float32)      # (TN, M)
        sc = sc - jnp.max(sc, axis=-1, keepdims=True)
        e = jnp.exp(sc)
        inv_den = pl.reciprocal(jnp.sum(e, axis=-1, keepdims=True), approx=True)
        prob = (e * inv_den).astype(jnp.bfloat16)
        head_out = jnp.dot(prob, vh, preferred_element_type=jnp.float32)  # (TN, dh)
        # fused merge: accumulate head_out @ Wm[head block]
        mm = mm + jnp.dot(head_out.astype(jnp.bfloat16), wm_ref[hh],
                          preferred_element_type=jnp.float32)
    mm = mm + bm_ref[...]

    # MLP: Conv1d(2D->2D) with cat([x, message]) eliminated via split weights,
    # then BatchNorm1d (eval, folded) -> ReLU -> Conv1d(2D->D).
    y1 = (jnp.dot(xb, w1x_ref[...], preferred_element_type=jnp.float32)
          + jnp.dot(mm.astype(jnp.bfloat16), w1m_ref[...],
                    preferred_element_type=jnp.float32)
          + b1_ref[...])
    y1 = y1 * bns_ref[...] + bnb_ref[...]
    y1 = jnp.maximum(y1, 0.0)
    y2 = jnp.dot(y1.astype(jnp.bfloat16), w2_ref[...],
                 preferred_element_type=jnp.float32) + b2_ref[...]

    if scaling != 1.0:  # static: skip a pointless VPU multiply when scaling == 1.0
        y2 = y2 * scaling
    o_ref[0] = y2


def attentional_propagation(x_ncl, src_ncl, params, num_heads,
                            scaling=1.0, block_n=None):
    """x_ncl: (B, D, N), src_ncl: (B, D, M) -> (B, D, N). Mirrors the PyTorch module."""
    B, D, N = x_ncl.shape
    M = src_ncl.shape[2]
    assert D % num_heads == 0
    head_dim = D // num_heads

    # PyTorch view(b, dim, h, n): channel c = d*h + head.  Kernel wants channel
    # j = head*dim + d (contiguous per-head blocks), so permute weight rows/cols.
    perm = jnp.array(
        [d * num_heads + hh for hh in range(num_heads) for d in range(head_dim)],
        dtype=jnp.int32,
    )

    wdt = jnp.bfloat16  # MXU operands in bf16; accumulation stays f32.
    f32 = jnp.float32

    wq = params["Wq"][perm, :].T.astype(wdt)
    bq = params["bq"][perm][None, :].astype(f32)
    wk = params["Wk"][perm, :].T.astype(wdt)
    bk = params["bk"][perm][None, :].astype(f32)
    wv = params["Wv"][perm, :].T.astype(wdt)
    bv = params["bv"][perm][None, :].astype(f32)
    # merge weight: rows grouped per head -> (H, head_dim, D)
    wm = params["Wm"][:, perm].T.reshape(num_heads, head_dim, D).astype(wdt)
    bm = params["bm"][None, :].astype(f32)

    w1t = params["W1"].T                      # (2D in, 2D out)
    w1x = w1t[:D, :].astype(wdt)              # multiplies x channels
    w1m = w1t[D:, :].astype(wdt)              # multiplies message channels
    b1 = params["b1"][None, :].astype(f32)

    eps = 1e-5
    bn_scale = params["bn_gamma"] / jnp.sqrt(params["bn_var"] + eps)
    bn_shift = params["bn_beta"] - params["bn_mean"] * bn_scale
    bns = bn_scale[None, :].astype(f32)
    bnb = bn_shift[None, :].astype(f32)

    w2 = params["W2"].T.astype(wdt)
    b2 = params["b2"][None, :].astype(f32)

    x_t = jnp.transpose(x_ncl, (0, 2, 1)).astype(wdt)    # (B, N, D)
    s_t = jnp.transpose(src_ncl, (0, 2, 1)).astype(wdt)  # (B, M, D)

    # --- Tile the query/output rows. ---
    if block_n is None:
        tn = 256 if N > 256 else ((N + 15) // 16) * 16
    else:
        tn = max(16, ((block_n + 15) // 16) * 16)
    n_pad = (-N) % tn
    if n_pad:
        x_t = jnp.pad(x_t, ((0, 0), (0, n_pad), (0, 0)))
    NP = N + n_pad
    n_tiles = NP // tn

    kernel = functools.partial(
        attn_prop_kernel, num_heads=num_heads, head_dim=head_dim,
        scaling=float(scaling),
    )

    def wspec(shape):
        zeros = (0,) * len(shape)
        return pl.BlockSpec(shape, lambda b, n: zeros)

    flops = int(B * (16 * NP * D * D + 4 * M * D * D + 4 * NP * M * D))
    transcendentals = int(B * num_heads * NP * M)
    bytes_accessed = int(
        B * (NP * D + M * D) * 2          # bf16 activations in
        + B * NP * D * 4                  # f32 output
        + (4 * D * D + 4 * D * D + 2 * D * D) * 2  # bf16 weights
        + 8 * D * 4                       # f32 biases / bn params
    )

    out = pl.pallas_call(
        kernel,
        out_shape=jax.ShapeDtypeStruct((B, NP, D), jnp.float32),
        grid=(B, n_tiles),
        in_specs=[
            pl.BlockSpec((1, tn, D), lambda b, n: (b, n, 0)),   # x tile
            pl.BlockSpec((1, M, D), lambda b, n: (b, 0, 0)),    # source (resident over n)
            wspec((D, D)), wspec((1, D)),                       # Wq, bq
            wspec((D, D)), wspec((1, D)),                       # Wk, bk
            wspec((D, D)), wspec((1, D)),                       # Wv, bv
            wspec((num_heads, head_dim, D)), wspec((1, D)),     # Wm (per-head), bm
            wspec((D, 2 * D)), wspec((D, 2 * D)), wspec((1, 2 * D)),  # W1x, W1m, b1
            wspec((1, 2 * D)), wspec((1, 2 * D)),               # bn scale, shift
            wspec((2 * D, D)), wspec((1, D)),                   # W2, b2
        ],
        out_specs=pl.BlockSpec((1, tn, D), lambda b, n: (b, n, 0)),
        scratch_shapes=[
            pltpu.VMEM((M, D), jnp.bfloat16),   # K, resident across N tiles
            pltpu.VMEM((M, D), jnp.bfloat16),   # V, resident across N tiles
        ],
        compiler_params=pltpu.CompilerParams(
            dimension_semantics=("parallel", "arbitrary"),
            vmem_limit_bytes=48 * 1024 * 1024,   # fits v7x's 64 MiB VMEM per TC
        ),
        cost_estimate=pl.CostEstimate(
            flops=flops,
            transcendentals=transcendentals,
            bytes_accessed=bytes_accessed,
        ),
    )(x_t, s_t, wq, bq, wk, bk, wv, bv, wm, bm,
      w1x, w1m, b1, bns, bnb, w2, b2)

    out = out[:, :N, :]
    return jnp.transpose(out, (0, 2, 1))  # back to (B, D, N)


def reference_forward(x, source, p, num_heads):
    """Pure-JAX f32 mirror of the PyTorch forward (NCL layout, eval-mode BN)."""
    def conv1d(inp, W, b):  # kernel_size=1
        return jnp.einsum("oi,bin->bon", W, inp) + b[None, :, None]

    B, D, N = x.shape
    dim = D // num_heads
    q = conv1d(x, p["Wq"], p["bq"]).reshape(B, dim, num_heads, N)
    k = conv1d(source, p["Wk"], p["bk"]).reshape(B, dim, num_heads, -1)
    v = conv1d(source, p["Wv"], p["bv"]).reshape(B, dim, num_heads, -1)
    scores = jnp.einsum("bdhn,bdhm->bhnm", q, k) / (dim ** 0.5)
    prob = jax.nn.softmax(scores, axis=-1)
    o = jnp.einsum("bhnm,bdhm->bdhn", prob, v)
    message = conv1d(o.reshape(B, D, N), p["Wm"], p["bm"])
    cat = jnp.concatenate([x, message], axis=1)
    y1 = conv1d(cat, p["W1"], p["b1"])
    eps = 1e-5
    y1 = (y1 - p["bn_mean"][None, :, None]) / jnp.sqrt(p["bn_var"] + eps)[None, :, None]
    y1 = y1 * p["bn_gamma"][None, :, None] + p["bn_beta"][None, :, None]
    y1 = jnp.maximum(y1, 0.0)
    y2 = conv1d(y1, p["W2"], p["b2"])
    return y2 * 1.0  # scaling = 1.0 (skip_init=False)


if __name__ == "__main__":
    # Small shapes; N=24 with block_n=16 exercises N-tiling + row padding,
    # B=2 feeds both v7x TensorCores via the parallel batch axis.
    B, D, N, M, H = 2, 32, 24, 32, 4

    key = jax.random.PRNGKey(0)
    ks = jax.random.split(key, 20)

    def rnd(k, shape, scale=0.1):
        return jax.random.normal(k, shape, dtype=jnp.float32) * scale

    params = {
        "Wq": rnd(ks[0], (D, D)), "bq": rnd(ks[1], (D,)),
        "Wk": rnd(ks[2], (D, D)), "bk": rnd(ks[3], (D,)),
        "Wv": rnd(ks[4], (D, D)), "bv": rnd(ks[5], (D,)),
        "Wm": rnd(ks[6], (D, D)), "bm": rnd(ks[7], (D,)),
        "W1": rnd(ks[8], (2 * D, 2 * D)), "b1": rnd(ks[9], (2 * D,)),
        "bn_gamma": 1.0 + rnd(ks[10], (2 * D,)),
        "bn_beta": rnd(ks[11], (2 * D,)),
        "bn_mean": rnd(ks[12], (2 * D,)),
        "bn_var": 0.5 + jnp.abs(rnd(ks[13], (2 * D,), scale=0.5)),
        "W2": rnd(ks[14], (D, 2 * D)),
        "b2": jnp.zeros((D,), jnp.float32),  # nn.init.constant_(mlp[-1].bias, 0.0)
    }

    x = rnd(ks[15], (B, D, N), scale=1.0)       # (B, num_dim, N)  -- NCL
    source = rnd(ks[16], (B, D, M), scale=1.0)  # (B, num_dim, M)  -- NCL

    out = attentional_propagation(x, source, params, num_heads=H, block_n=16)
    out = jax.block_until_ready(out)

    ref = reference_forward(x, source, params, num_heads=H)
    assert out.shape == (B, D, N)
    # bf16 MXU operands + approx reciprocal -> loosen from the old f32 1e-4 tol.
    assert jnp.allclose(out, ref, rtol=5e-2, atol=5e-2), (
        f"max abs err {jnp.max(jnp.abs(out - ref))}"
    )

    print("KERNEL_OK")
</pallas_src>

<mosaic_0001>
module attributes {stable_mosaic.version = 11 : i64} {
  func.func @attn_prop_kernel(%arg0: i32, %arg1: i32, %arg2: memref<1x16x32xbf16, #tpu.memory_space<vmem>>, %arg3: memref<1x32x32xbf16, #tpu.memory_space<vmem>>, %arg4: memref<32x32xbf16, #tpu.memory_space<vmem>>, %arg5: memref<1x32xf32, #tpu.memory_space<vmem>>, %arg6: memref<32x32xbf16, #tpu.memory_space<vmem>>, %arg7: memref<1x32xf32, #tpu.memory_space<vmem>>, %arg8: memref<32x32xbf16, #tpu.memory_space<vmem>>, %arg9: memref<1x32xf32, #tpu.memory_space<vmem>>, %arg10: memref<4x8x32xbf16, #tpu.memory_space<vmem>>, %arg11: memref<1x32xf32, #tpu.memory_space<vmem>>, %arg12: memref<32x64xbf16, #tpu.memory_space<vmem>>, %arg13: memref<32x64xbf16, #tpu.memory_space<vmem>>, %arg14: memref<1x64xf32, #tpu.memory_space<vmem>>, %arg15: memref<1x64xf32, #tpu.memory_space<vmem>>, %arg16: memref<1x64xf32, #tpu.memory_space<vmem>>, %arg17: memref<64x32xbf16, #tpu.memory_space<vmem>>, %arg18: memref<1x32xf32, #tpu.memory_space<vmem>>, %arg19: memref<1x16x32xf32, #tpu.memory_space<vmem>>, %arg20: memref<32x32xbf16, #tpu.memory_space<vmem>>, %arg21: memref<32x32xbf16, #tpu.memory_space<vmem>>) attributes {dimension_semantics = [#tpu.dimension_semantics<parallel>, #tpu.dimension_semantics<arbitrary>], iteration_bounds = array<i64: 2, 2>, scalar_prefetch = 0 : i64, scratch_operands = 2 : i64, tpu.core_type = #tpu.core_type<tc>, window_params = [{transform_indices = @transform_0, window_bounds = array<i64: 1, 16, 32>}, {transform_indices = @transform_1, window_bounds = array<i64: 1, 32, 32>}, {pipeline_mode = #tpu.pipeline_mode<synchronous>, transform_indices = @transform_2, window_bounds = array<i64: 32, 32>}, {pipeline_mode = #tpu.pipeline_mode<synchronous>, transform_indices = @transform_3, window_bounds = array<i64: 1, 32>}, {pipeline_mode = #tpu.pipeline_mode<synchronous>, transform_indices = @transform_4, window_bounds = array<i64: 32, 32>}, {pipeline_mode = #tpu.pipeline_mode<synchronous>, transform_indices = @transform_5, window_bounds = array<i64: 1, 32>}, {pipeline_mode = #tpu.pipeline_mode<synchronous>, transform_indices = @transform_6, window_bounds = array<i64: 32, 32>}, {pipeline_mode = #tpu.pipeline_mode<synchronous>, transform_indices = @transform_7, window_bounds = array<i64: 1, 32>}, {pipeline_mode = #tpu.pipeline_mode<synchronous>, transform_indices = @transform_8, window_bounds = array<i64: 4, 8, 32>}, {pipeline_mode = #tpu.pipeline_mode<synchronous>, transform_indices = @transform_9, window_bounds = array<i64: 1, 32>}, {pipeline_mode = #tpu.pipeline_mode<synchronous>, transform_indices = @transform_10, window_bounds = array<i64: 32, 64>}, {pipeline_mode = #tpu.pipeline_mode<synchronous>, transform_indices = @transform_11, window_bounds = array<i64: 32, 64>}, {pipeline_mode = #tpu.pipeline_mode<synchronous>, transform_indices = @transform_12, window_bounds = array<i64: 1, 64>}, {pipeline_mode = #tpu.pipeline_mode<synchronous>, transform_indices = @transform_13, window_bounds = array<i64: 1, 64>}, {pipeline_mode = #tpu.pipeline_mode<synchronous>, transform_indices = @transform_14, window_bounds = array<i64: 1, 64>}, {pipeline_mode = #tpu.pipeline_mode<synchronous>, transform_indices = @transform_15, window_bounds = array<i64: 64, 32>}, {pipeline_mode = #tpu.pipeline_mode<synchronous>, transform_indices = @transform_16, window_bounds = array<i64: 1, 32>}, {transform_indices = @transform_17, window_bounds = array<i64: 1, 16, 32>}]} {
    %c0_i32 = arith.constant 0 : i32
    %0 = arith.cmpi eq, %arg1, %c0_i32 : i32
    %1 = arith.extui %0 : i1 to i32
    %c0_i32_0 = arith.constant 0 : i32
    %2 = arith.cmpi ne, %1, %c0_i32_0 : i32
    scf.if %2 {
      %c0_74 = arith.constant 0 : index
      %c0_75 = arith.constant 0 : index
      %c0_76 = arith.constant 0 : index
      %127 = vector.load %arg3[%c0_74, %c0_75, %c0_76] : memref<1x32x32xbf16, #tpu.memory_space<vmem>>, vector<1x32x32xbf16>
      %128 = vector.shape_cast %127 : vector<1x32x32xbf16> to vector<32x32xbf16>
      %c0_77 = arith.constant 0 : index
      %c0_78 = arith.constant 0 : index
      %129 = vector.load %arg6[%c0_77, %c0_78] : memref<32x32xbf16, #tpu.memory_space<vmem>>, vector<32x32xbf16>
      %cst_79 = arith.constant dense<0.000000e+00> : vector<32x32xf32>
      %130 = tpu.matmul %128, %129, %cst_79 {dimension_numbers = #tpu.dot_dimension_numbers<[1], [0], [0], [1], [0, 0, 1, 1], [], []>} : vector<32x32xbf16>, vector<32x32xbf16>, vector<32x32xf32> -> vector<32x32xf32>
      %c0_80 = arith.constant 0 : index
      %c0_81 = arith.constant 0 : index
      %131 = vector.load %arg7[%c0_80, %c0_81] : memref<1x32xf32, #tpu.memory_space<vmem>>, vector<1x32xf32>
      %132 = vector.broadcast %131 : vector<1x32xf32> to vector<32x32xf32>
      %133 = arith.addf %130, %132 : vector<32x32xf32>
      %c0_82 = arith.constant 0 : index
      %c0_83 = arith.constant 0 : index
      %134 = vector.load %arg8[%c0_82, %c0_83] : memref<32x32xbf16, #tpu.memory_space<vmem>>, vector<32x32xbf16>
      %cst_84 = arith.constant dense<0.000000e+00> : vector<32x32xf32>
      %135 = tpu.matmul %128, %134, %cst_84 {dimension_numbers = #tpu.dot_dimension_numbers<[1], [0], [0], [1], [0, 0, 1, 1], [], []>} : vector<32x32xbf16>, vector<32x32xbf16>, vector<32x32xf32> -> vector<32x32xf32>
      %c0_85 = arith.constant 0 : index
      %c0_86 = arith.constant 0 : index
      %136 = vector.load %arg9[%c0_85, %c0_86] : memref<1x32xf32, #tpu.memory_space<vmem>>, vector<1x32xf32>
      %137 = vector.broadcast %136 : vector<1x32xf32> to vector<32x32xf32>
      %138 = arith.addf %135, %137 : vector<32x32xf32>
      %139 = arith.truncf %133 : vector<32x32xf32> to vector<32x32xbf16>
      %c0_87 = arith.constant 0 : index
      %c0_88 = arith.constant 0 : index
      %140 = vector.load %arg20[%c0_87, %c0_88] : memref<32x32xbf16, #tpu.memory_space<vmem>>, vector<32x32xbf16>
      tpu.vector_store %arg20[%c0_87, %c0_88], %139 {strides = array<i32>} : memref<32x32xbf16, #tpu.memory_space<vmem>>, vector<32x32xbf16>,
      %141 = arith.truncf %138 : vector<32x32xf32> to vector<32x32xbf16>
      %c0_89 = arith.constant 0 : index
      %c0_90 = arith.constant 0 : index
      %142 = vector.load %arg21[%c0_89, %c0_90] : memref<32x32xbf16, #tpu.memory_space<vmem>>, vector<32x32xbf16>
      tpu.vector_store %arg21[%c0_89, %c0_90], %141 {strides = array<i32>} : memref<32x32xbf16, #tpu.memory_space<vmem>>, vector<32x32xbf16>,
    } else {
    }
    %c0 = arith.constant 0 : index
    %c0_1 = arith.constant 0 : index
    %c0_2 = arith.constant 0 : index
    %3 = vector.load %arg2[%c0, %c0_1, %c0_2] : memref<1x16x32xbf16, #tpu.memory_space<vmem>>, vector<1x16x32xbf16>
    %4 = vector.shape_cast %3 : vector<1x16x32xbf16> to vector<16x32xbf16>
    %c0_3 = arith.constant 0 : index
    %c0_4 = arith.constant 0 : index
    %5 = vector.load %arg4[%c0_3, %c0_4] : memref<32x32xbf16, #tpu.memory_space<vmem>>, vector<32x32xbf16>
    %cst = arith.constant dense<0.000000e+00> : vector<16x32xf32>
    %6 = tpu.matmul %4, %5, %cst {dimension_numbers = #tpu.dot_dimension_numbers<[1], [0], [0], [1], [0, 0, 1, 1], [], []>} : vector<16x32xbf16>, vector<32x32xbf16>, vector<16x32xf32> -> vector<16x32xf32>
    %c0_5 = arith.constant 0 : index
    %c0_6 = arith.constant 0 : index
    %7 = vector.load %arg5[%c0_5, %c0_6] : memref<1x32xf32, #tpu.memory_space<vmem>>, vector<1x32xf32>
    %8 = vector.broadcast %7 : vector<1x32xf32> to vector<16x32xf32>
    %9 = arith.addf %6, %8 : vector<16x32xf32>
    %cst_7 = arith.constant 0.353553385 : f32
    %10 = vector.broadcast %cst_7 : f32 to vector<16x32xf32>
    %11 = arith.mulf %9, %10 : vector<16x32xf32>
    %12 = arith.truncf %11 : vector<16x32xf32> to vector<16x32xbf16>
    %cst_8 = arith.constant 0.000000e+00 : f32
    %13 = vector.broadcast %cst_8 : f32 to vector<16x32xf32>
    %14 = vector.extract_strided_slice %12 {offsets = [0, 0], sizes = [16, 8], strides = [1, 1]} : vector<16x32xbf16> to vector<16x8xbf16>
    %c0_9 = arith.constant 0 : index
    %c0_10 = arith.constant 0 : index
    %15 = vector.load %arg20[%c0_9, %c0_10] : memref<32x32xbf16, #tpu.memory_space<vmem>>, vector<32x8xbf16>
    %c0_11 = arith.constant 0 : index
    %c0_12 = arith.constant 0 : index
    %16 = vector.load %arg21[%c0_11, %c0_12] : memref<32x32xbf16, #tpu.memory_space<vmem>>, vector<32x8xbf16>
    %cst_13 = arith.constant dense<0.000000e+00> : vector<16x32xf32>
    %17 = tpu.matmul %14, %15, %cst_13 {dimension_numbers = #tpu.dot_dimension_numbers<[1], [1], [0], [0], [0, 0, 1, 0], [], []>} : vector<16x8xbf16>, vector<32x8xbf16>, vector<16x32xf32> -> vector<16x32xf32>
    %cst_14 = arith.constant dense<0xFF800000> : vector<16xf32>
    %18 = vector.multi_reduction <maximumf>, %17, %cst_14 [1] : vector<16x32xf32> to vector<16xf32>
    %19 = vector.shape_cast %18 : vector<16xf32> to vector<16x1xf32>
    %20 = vector.broadcast %19 : vector<16x1xf32> to vector<16x32xf32>
    %21 = arith.subf %17, %20 : vector<16x32xf32>
    %22 = math.exp %21 : vector<16x32xf32>
    %cst_15 = arith.constant dense<0.000000e+00> : vector<16xf32>
    %23 = vector.multi_reduction <add>, %22, %cst_15 [1] : vector<16x32xf32> to vector<16xf32>
    %24 = vector.shape_cast %23 : vector<16xf32> to vector<16x1xf32>
    %25 = tpu.reciprocal %24 {approx = true} : vector<16x1xf32> -> vector<16x1xf32>
    %26 = vector.broadcast %25 : vector<16x1xf32> to vector<16x32xf32>
    %27 = arith.mulf %22, %26 : vector<16x32xf32>
    %28 = arith.truncf %27 : vector<16x32xf32> to vector<16x32xbf16>
    %cst_16 = arith.constant dense<0.000000e+00> : vector<16x8xf32>
    %29 = tpu.matmul %28, %16, %cst_16 {dimension_numbers = #tpu.dot_dimension_numbers<[1], [0], [0], [1], [0, 0, 1, 1], [], []>} : vector<16x32xbf16>, vector<32x8xbf16>, vector<16x8xf32> -> vector<16x8xf32>
    %30 = arith.truncf %29 : vector<16x8xf32> to vector<16x8xbf16>
    %c0_17 = arith.constant 0 : index
    %c0_18 = arith.constant 0 : index
    %c0_19 = arith.constant 0 : index
    %31 = vector.load %arg10[%c0_17, %c0_18, %c0_19] : memref<4x8x32xbf16, #tpu.memory_space<vmem>>, vector<1x8x32xbf16>
    %32 = vector.shape_cast %31 : vector<1x8x32xbf16> to vector<8x32xbf16>
    %cst_20 = arith.constant dense<0.000000e+00> : vector<16x32xf32>
    %33 = tpu.matmul %30, %32, %cst_20 {dimension_numbers = #tpu.dot_dimension_numbers<[1], [0], [0], [1], [0, 0, 1, 1], [], []>} : vector<16x8xbf16>, vector<8x32xbf16>, vector<16x32xf32> -> vector<16x32xf32>
    %34 = arith.addf %13, %33 : vector<16x32xf32>
    %35 = vector.extract_strided_slice %12 {offsets = [0, 8], sizes = [16, 8], strides = [1, 1]} : vector<16x32xbf16> to vector<16x8xbf16>
    %c0_21 = arith.constant 0 : index
    %c8 = arith.constant 8 : index
    %36 = vector.load %arg20[%c0_21, %c8] : memref<32x32xbf16, #tpu.memory_space<vmem>>, vector<32x8xbf16>
    %c0_22 = arith.constant 0 : index
    %c8_23 = arith.constant 8 : index
    %37 = vector.load %arg21[%c0_22, %c8_23] : memref<32x32xbf16, #tpu.memory_space<vmem>>, vector<32x8xbf16>
    %cst_24 = arith.constant dense<0.000000e+00> : vector<16x32xf32>
    %38 = tpu.matmul %35, %36, %cst_24 {dimension_numbers = #tpu.dot_dimension_numbers<[1], [1], [0], [0], [0, 0, 1, 0], [], []>} : vector<16x8xbf16>, vector<32x8xbf16>, vector<16x32xf32> -> vector<16x32xf32>
    %cst_25 = arith.constant dense<0xFF800000> : vector<16xf32>
    %39 = vector.multi_reduction <maximumf>, %38, %cst_25 [1] : vector<16x32xf32> to vector<16xf32>
    %40 = vector.shape_cast %39 : vector<16xf32> to vector<16x1xf32>
    %41 = vector.broadcast %40 : vector<16x1xf32> to vector<16x32xf32>
    %42 = arith.subf %38, %41 : vector<16x32xf32>
    %43 = math.exp %42 : vector<16x32xf32>
    %cst_26 = arith.constant dense<0.000000e+00> : vector<16xf32>
    %44 = vector.multi_reduction <add>, %43, %cst_26 [1] : vector<16x32xf32> to vector<16xf32>
    %45 = vector.shape_cast %44 : vector<16xf32> to vector<16x1xf32>
    %46 = tpu.reciprocal %45 {approx = true} : vector<16x1xf32> -> vector<16x1xf32>
    %47 = vector.broadcast %46 : vector<16x1xf32> to vector<16x32xf32>
    %48 = arith.mulf %43, %47 : vector<16x32xf32>
    %49 = arith.truncf %48 : vector<16x32xf32> to vector<16x32xbf16>
    %cst_27 = arith.constant dense<0.000000e+00> : vector<16x8xf32>
    %50 = tpu.matmul %49, %37, %cst_27 {dimension_numbers = #tpu.dot_dimension_numbers<[1], [0], [0], [1], [0, 0, 1, 1], [], []>} : vector<16x32xbf16>, vector<32x8xbf16>, vector<16x8xf32> -> vector<16x8xf32>
    %51 = arith.truncf %50 : vector<16x8xf32> to vector<16x8xbf16>
    %c1 = arith.constant 1 : index
    %c0_28 = arith.constant 0 : index
    %c0_29 = arith.constant 0 : index
    %52 = vector.load %arg10[%c1, %c0_28, %c0_29] : memref<4x8x32xbf16, #tpu.memory_space<vmem>>, vector<1x8x32xbf16>
    %53 = vector.shape_cast %52 : vector<1x8x32xbf16> to vector<8x32xbf16>
    %cst_30 = arith.constant dense<0.000000e+00> : vector<16x32xf32>
    %54 = tpu.matmul %51, %53, %cst_30 {dimension_numbers = #tpu.dot_dimension_numbers<[1], [0], [0], [1], [0, 0, 1, 1], [], []>} : vector<16x8xbf16>, vector<8x32xbf16>, vector<16x32xf32> -> vector<16x32xf32>
    %55 = arith.addf %34, %54 : vector<16x32xf32>
    %56 = vector.extract_strided_slice %12 {offsets = [0, 16], sizes = [16, 8], strides = [1, 1]} : vector<16x32xbf16> to vector<16x8xbf16>
    %c0_31 = arith.constant 0 : index
    %c16 = arith.constant 16 : index
    %57 = vector.load %arg20[%c0_31, %c16] : memref<32x32xbf16, #tpu.memory_space<vmem>>, vector<32x8xbf16>
    %c0_32 = arith.constant 0 : index
    %c16_33 = arith.constant 16 : index
    %58 = vector.load %arg21[%c0_32, %c16_33] : memref<32x32xbf16, #tpu.memory_space<vmem>>, vector<32x8xbf16>
    %cst_34 = arith.constant dense<0.000000e+00> : vector<16x32xf32>
    %59 = tpu.matmul %56, %57, %cst_34 {dimension_numbers = #tpu.dot_dimension_numbers<[1], [1], [0], [0], [0, 0, 1, 0], [], []>} : vector<16x8xbf16>, vector<32x8xbf16>, vector<16x32xf32> -> vector<16x32xf32>
    %cst_35 = arith.constant dense<0xFF800000> : vector<16xf32>
    %60 = vector.multi_reduction <maximumf>, %59, %cst_35 [1] : vector<16x32xf32> to vector<16xf32>
    %61 = vector.shape_cast %60 : vector<16xf32> to vector<16x1xf32>
    %62 = vector.broadcast %61 : vector<16x1xf32> to vector<16x32xf32>
    %63 = arith.subf %59, %62 : vector<16x32xf32>
    %64 = math.exp %63 : vector<16x32xf32>
    %cst_36 = arith.constant dense<0.000000e+00> : vector<16xf32>
    %65 = vector.multi_reduction <add>, %64, %cst_36 [1] : vector<16x32xf32> to vector<16xf32>
    %66 = vector.shape_cast %65 : vector<16xf32> to vector<16x1xf32>
    %67 = tpu.reciprocal %66 {approx = true} : vector<16x1xf32> -> vector<16x1xf32>
    %68 = vector.broadcast %67 : vector<16x1xf32> to vector<16x32xf32>
    %69 = arith.mulf %64, %68 : vector<16x32xf32>
    %70 = arith.truncf %69 : vector<16x32xf32> to vector<16x32xbf16>
    %cst_37 = arith.constant dense<0.000000e+00> : vector<16x8xf32>
    %71 = tpu.matmul %70, %58, %cst_37 {dimension_numbers = #tpu.dot_dimension_numbers<[1], [0], [0], [1], [0, 0, 1, 1], [], []>} : vector<16x32xbf16>, vector<32x8xbf16>, vector<16x8xf32> -> vector<16x8xf32>
    %72 = arith.truncf %71 : vector<16x8xf32> to vector<16x8xbf16>
    %c2 = arith.constant 2 : index
    %c0_38 = arith.constant 0 : index
    %c0_39 = arith.constant 0 : index
    %73 = vector.load %arg10[%c2, %c0_38, %c0_39] : memref<4x8x32xbf16, #tpu.memory_space<vmem>>, vector<1x8x32xbf16>
    %74 = vector.shape_cast %73 : vector<1x8x32xbf16> to vector<8x32xbf16>
    %cst_40 = arith.constant dense<0.000000e+00> : vector<16x32xf32>
    %75 = tpu.matmul %72, %74, %cst_40 {dimension_numbers = #tpu.dot_dimension_numbers<[1], [0], [0], [1], [0, 0, 1, 1], [], []>} : vector<16x8xbf16>, vector<8x32xbf16>, vector<16x32xf32> -> vector<16x32xf32>
    %76 = arith.addf %55, %75 : vector<16x32xf32>
    %77 = vector.extract_strided_slice %12 {offsets = [0, 24], sizes = [16, 8], strides = [1, 1]} : vector<16x32xbf16> to vector<16x8xbf16>
    %c0_41 = arith.constant 0 : index
    %c24 = arith.constant 24 : index
    %78 = vector.load %arg20[%c0_41, %c24] : memref<32x32xbf16, #tpu.memory_space<vmem>>, vector<32x8xbf16>
    %c0_42 = arith.constant 0 : index
    %c24_43 = arith.constant 24 : index
    %79 = vector.load %arg21[%c0_42, %c24_43] : memref<32x32xbf16, #tpu.memory_space<vmem>>, vector<32x8xbf16>
    %cst_44 = arith.constant dense<0.000000e+00> : vector<16x32xf32>
    %80 = tpu.matmul %77, %78, %cst_44 {dimension_numbers = #tpu.dot_dimension_numbers<[1], [1], [0], [0], [0, 0, 1, 0], [], []>} : vector<16x8xbf16>, vector<32x8xbf16>, vector<16x32xf32> -> vector<16x32xf32>
    %cst_45 = arith.constant dense<0xFF800000> : vector<16xf32>
    %81 = vector.multi_reduction <maximumf>, %80, %cst_45 [1] : vector<16x32xf32> to vector<16xf32>
    %82 = vector.shape_cast %81 : vector<16xf32> to vector<16x1xf32>
    %83 = vector.broadcast %82 : vector<16x1xf32> to vector<16x32xf32>
    %84 = arith.subf %80, %83 : vector<16x32xf32>
    %85 = math.exp %84 : vector<16x32xf32>
    %cst_46 = arith.constant dense<0.000000e+00> : vector<16xf32>
    %86 = vector.multi_reduction <add>, %85, %cst_46 [1] : vector<16x32xf32> to vector<16xf32>
    %87 = vector.shape_cast %86 : vector<16xf32> to vector<16x1xf32>
    %88 = tpu.reciprocal %87 {approx = true} : vector<16x1xf32> -> vector<16x1xf32>
    %89 = vector.broadcast %88 : vector<16x1xf32> to vector<16x32xf32>
    %90 = arith.mulf %85, %89 : vector<16x32xf32>
    %91 = arith.truncf %90 : vector<16x32xf32> to vector<16x32xbf16>
    %cst_47 = arith.constant dense<0.000000e+00> : vector<16x8xf32>
    %92 = tpu.matmul %91, %79, %cst_47 {dimension_numbers = #tpu.dot_dimension_numbers<[1], [0], [0], [1], [0, 0, 1, 1], [], []>} : vector<16x32xbf16>, vector<32x8xbf16>, vector<16x8xf32> -> vector<16x8xf32>
    %93 = arith.truncf %92 : vector<16x8xf32> to vector<16x8xbf16>
    %c3 = arith.constant 3 : index
    %c0_48 = arith.constant 0 : index
    %c0_49 = arith.constant 0 : index
    %94 = vector.load %arg10[%c3, %c0_48, %c0_49] : memref<4x8x32xbf16, #tpu.memory_space<vmem>>, vector<1x8x32xbf16>
    %95 = vector.shape_cast %94 : vector<1x8x32xbf16> to vector<8x32xbf16>
    %cst_50 = arith.constant dense<0.000000e+00> : vector<16x32xf32>
    %96 = tpu.matmul %93, %95, %cst_50 {dimension_numbers = #tpu.dot_dimension_numbers<[1], [0], [0], [1], [0, 0, 1, 1], [], []>} : vector<16x8xbf16>, vector<8x32xbf16>, vector<16x32xf32> -> vector<16x32xf32>
    %97 = arith.addf %76, %96 : vector<16x32xf32>
    %c0_51 = arith.constant 0 : index
    %c0_52 = arith.constant 0 : index
    %98 = vector.load %arg11[%c0_51, %c0_52] : memref<1x32xf32, #tpu.memory_space<vmem>>, vector<1x32xf32>
    %99 = vector.broadcast %98 : vector<1x32xf32> to vector<16x32xf32>
    %100 = arith.addf %97, %99 : vector<16x32xf32>
    %c0_53 = arith.constant 0 : index
    %c0_54 = arith.constant 0 : index
    %101 = vector.load %arg12[%c0_53, %c0_54] : memref<32x64xbf16, #tpu.memory_space<vmem>>, vector<32x64xbf16>
    %cst_55 = arith.constant dense<0.000000e+00> : vector<16x64xf32>
    %102 = tpu.matmul %4, %101, %cst_55 {dimension_numbers = #tpu.dot_dimension_numbers<[1], [0], [0], [1], [0, 0, 1, 1], [], []>} : vector<16x32xbf16>, vector<32x64xbf16>, vector<16x64xf32> -> vector<16x64xf32>
    %103 = arith.truncf %100 : vector<16x32xf32> to vector<16x32xbf16>
    %c0_56 = arith.constant 0 : index
    %c0_57 = arith.constant 0 : index
    %104 = vector.load %arg13[%c0_56, %c0_57] : memref<32x64xbf16, #tpu.memory_space<vmem>>, vector<32x64xbf16>
    %cst_58 = arith.constant dense<0.000000e+00> : vector<16x64xf32>
    %105 = tpu.matmul %103, %104, %cst_58 {dimension_numbers = #tpu.dot_dimension_numbers<[1], [0], [0], [1], [0, 0, 1, 1], [], []>} : vector<16x32xbf16>, vector<32x64xbf16>, vector<16x64xf32> -> vector<16x64xf32>
    %106 = arith.addf %102, %105 : vector<16x64xf32>
    %c0_59 = arith.constant 0 : index
    %c0_60 = arith.constant 0 : index
    %107 = vector.load %arg14[%c0_59, %c0_60] : memref<1x64xf32, #tpu.memory_space<vmem>>, vector<1x64xf32>
    %108 = vector.broadcast %107 : vector<1x64xf32> to vector<16x64xf32>
    %109 = arith.addf %106, %108 : vector<16x64xf32>
    %c0_61 = arith.constant 0 : index
    %c0_62 = arith.constant 0 : index
    %110 = vector.load %arg15[%c0_61, %c0_62] : memref<1x64xf32, #tpu.memory_space<vmem>>, vector<1x64xf32>
    %111 = vector.broadcast %110 : vector<1x64xf32> to vector<16x64xf32>
    %112 = arith.mulf %109, %111 : vector<16x64xf32>
    %c0_63 = arith.constant 0 : index
    %c0_64 = arith.constant 0 : index
    %113 = vector.load %arg16[%c0_63, %c0_64] : memref<1x64xf32, #tpu.memory_space<vmem>>, vector<1x64xf32>
    %114 = vector.broadcast %113 : vector<1x64xf32> to vector<16x64xf32>
    %115 = arith.addf %112, %114 : vector<16x64xf32>
    %cst_65 = arith.constant 0.000000e+00 : f32
    %116 = vector.broadcast %cst_65 : f32 to vector<16x64xf32>
    %117 = arith.maximumf %115, %116 : vector<16x64xf32>
    %118 = arith.truncf %117 : vector<16x64xf32> to vector<16x64xbf16>
    %c0_66 = arith.constant 0 : index
    %c0_67 = arith.constant 0 : index
    %119 = vector.load %arg17[%c0_66, %c0_67] : memref<64x32xbf16, #tpu.memory_space<vmem>>, vector<64x32xbf16>
    %cst_68 = arith.constant dense<0.000000e+00> : vector<16x32xf32>
    %120 = tpu.matmul %118, %119, %cst_68 {dimension_numbers = #tpu.dot_dimension_numbers<[1], [0], [0], [1], [0, 0, 1, 1], [], []>} : vector<16x64xbf16>, vector<64x32xbf16>, vector<16x32xf32> -> vector<16x32xf32>
    %c0_69 = arith.constant 0 : index
    %c0_70 = arith.constant 0 : index
    %121 = vector.load %arg18[%c0_69, %c0_70] : memref<1x32xf32, #tpu.memory_space<vmem>>, vector<1x32xf32>
    %122 = vector.broadcast %121 : vector<1x32xf32> to vector<16x32xf32>
    %123 = arith.addf %120, %122 : vector<16x32xf32>
    %c0_71 = arith.constant 0 : index
    %c0_72 = arith.constant 0 : index
    %c0_73 = arith.constant 0 : index
    %124 = vector.load %arg19[%c0_71, %c0_72, %c0_73] : memref<1x16x32xf32, #tpu.memory_space<vmem>>, vector<1x16x32xf32>
    %125 = vector.shape_cast %124 : vector<1x16x32xf32> to vector<16x32xf32>
    %126 = vector.shape_cast %123 : vector<16x32xf32> to vector<1x16x32xf32>
    tpu.vector_store %arg19[%c0_71, %c0_72, %c0_73], %126 {strides = array<i32>} : memref<1x16x32xf32, #tpu.memory_space<vmem>>, vector<1x16x32xf32>,
    return
  }
  func.func @transform_0(%arg0: i32, %arg1: i32) -> (i32, i32, i32) {
    %c0_i32 = arith.constant 0 : i32
    %c0_i32_0 = arith.constant 0 : i32
    return %arg0, %arg1, %c0_i32 : i32, i32, i32
  }
  func.func @transform_1(%arg0: i32, %arg1: i32) -> (i32, i32, i32) {
    %c0_i32 = arith.constant 0 : i32
    %c0_i32_0 = arith.constant 0 : i32
    %c0_i32_1 = arith.constant 0 : i32
    return %arg0, %c0_i32, %c0_i32_0 : i32, i32, i32
  }
  func.func @transform_2(%arg0: i32, %arg1: i32) -> (i32, i32) {
    %c0_i32 = arith.constant 0 : i32
    %c0_i32_0 = arith.constant 0 : i32
    %c0_i32_1 = arith.constant 0 : i32
    return %c0_i32, %c0_i32_0 : i32, i32
  }
  func.func @transform_3(%arg0: i32, %arg1: i32) -> (i32, i32) {
    %c0_i32 = arith.constant 0 : i32
    %c0_i32_0 = arith.constant 0 : i32
    %c0_i32_1 = arith.constant 0 : i32
    return %c0_i32, %c0_i32_0 : i32, i32
  }
  func.func @transform_4(%arg0: i32, %arg1: i32) -> (i32, i32) {
    %c0_i32 = arith.constant 0 : i32
    %c0_i32_0 = arith.constant 0 : i32
    %c0_i32_1 = arith.constant 0 : i32
    return %c0_i32, %c0_i32_0 : i32, i32
  }
  func.func @transform_5(%arg0: i32, %arg1: i32) -> (i32, i32) {
    %c0_i32 = arith.constant 0 : i32
    %c0_i32_0 = arith.constant 0 : i32
    %c0_i32_1 = arith.constant 0 : i32
    return %c0_i32, %c0_i32_0 : i32, i32
  }
  func.func @transform_6(%arg0: i32, %arg1: i32) -> (i32, i32) {
    %c0_i32 = arith.constant 0 : i32
    %c0_i32_0 = arith.constant 0 : i32
    %c0_i32_1 = arith.constant 0 : i32
    return %c0_i32, %c0_i32_0 : i32, i32
  }
  func.func @transform_7(%arg0: i32, %arg1: i32) -> (i32, i32) {
    %c0_i32 = arith.constant 0 : i32
    %c0_i32_0 = arith.constant 0 : i32
    %c0_i32_1 = arith.constant 0 : i32
    return %c0_i32, %c0_i32_0 : i32, i32
  }
  func.func @transform_8(%arg0: i32, %arg1: i32) -> (i32, i32, i32) {
    %c0_i32 = arith.constant 0 : i32
    %c0_i32_0 = arith.constant 0 : i32
    %c0_i32_1 = arith.constant 0 : i32
    %c0_i32_2 = arith.constant 0 : i32
    return %c0_i32, %c0_i32_0, %c0_i32_1 : i32, i32, i32
  }
  func.func @transform_9(%arg0: i32, %arg1: i32) -> (i32, i32) {
    %c0_i32 = arith.constant 0 : i32
    %c0_i32_0 = arith.constant 0 : i32
    %c0_i32_1 = arith.constant 0 : i32
    return %c0_i32, %c0_i32_0 : i32, i32
  }
  func.func @transform_10(%arg0: i32, %arg1: i32) -> (i32, i32) {
    %c0_i32 = arith.constant 0 : i32
    %c0_i32_0 = arith.constant 0 : i32
    %c0_i32_1 = arith.constant 0 : i32
    return %c0_i32, %c0_i32_0 : i32, i32
  }
  func.func @transform_11(%arg0: i32, %arg1: i32) -> (i32, i32) {
    %c0_i32 = arith.constant 0 : i32
    %c0_i32_0 = arith.constant 0 : i32
    %c0_i32_1 = arith.constant 0 : i32
    return %c0_i32, %c0_i32_0 : i32, i32
  }
  func.func @transform_12(%arg0: i32, %arg1: i32) -> (i32, i32) {
    %c0_i32 = arith.constant 0 : i32
    %c0_i32_0 = arith.constant 0 : i32
    %c0_i32_1 = arith.constant 0 : i32
    return %c0_i32, %c0_i32_0 : i32, i32
  }
  func.func @transform_13(%arg0: i32, %arg1: i32) -> (i32, i32) {
    %c0_i32 = arith.constant 0 : i32
    %c0_i32_0 = arith.constant 0 : i32
    %c0_i32_1 = arith.constant 0 : i32
    return %c0_i32, %c0_i32_0 : i32, i32
  }
  func.func @transform_14(%arg0: i32, %arg1: i32) -> (i32, i32) {
    %c0_i32 = arith.constant 0 : i32
    %c0_i32_0 = arith.constant 0 : i32
    %c0_i32_1 = arith.constant 0 : i32
    return %c0_i32, %c0_i32_0 : i32, i32
  }
  func.func @transform_15(%arg0: i32, %arg1: i32) -> (i32, i32) {
    %c0_i32 = arith.constant 0 : i32
    %c0_i32_0 = arith.constant 0 : i32
    %c0_i32_1 = arith.constant 0 : i32
    return %c0_i32, %c0_i32_0 : i32, i32
  }
  func.func @transform_16(%arg0: i32, %arg1: i32) -> (i32, i32) {
    %c0_i32 = arith.constant 0 : i32
    %c0_i32_0 = arith.constant 0 : i32
    %c0_i32_1 = arith.constant 0 : i32
    return %c0_i32, %c0_i32_0 : i32, i32
  }
  func.func @transform_17(%arg0: i32, %arg1: i32) -> (i32, i32, i32) {
    %c0_i32 = arith.constant 0 : i32
    %c0_i32_0 = arith.constant 0 : i32
    return %arg0, %arg1, %c0_i32 : i32, i32, i32
  }
}

</mosaic_0001>

<bundles_post_ra>
// kernel: tpu_custom_call.1
= control target key start
LH: loop header
LB: loop body
LE: loop exit
PB: predicated region body
PF: predicated region fallthrough
CT: control target
= control target key end

     0   :  { %s2811_s0 = inlined_call_operand.vmem [shape: bf16[2,32,32], index: 0, kind: input, shape index: {}]   ;;  %s2812_s1 = inlined_call_operand.hbm [shape: bf16[2,32,32], index: 1, kind: input, shape index: {}]   ;;  %s2813_s2 = inlined_call_operand.vmem [shape: bf16[32,32], index: 2, kind: input, shape index: {}]   ;;  %s2814_s3 = inlined_call_operand.vmem [shape: f32[1,32], index: 3, kind: input, shape index: {}]   ;;  %s2815_s4 = inlined_call_operand.hbm [shape: bf16[32,32], index: 4, kind: input, shape index: {}]   ;;  %s2816_s5 = inlined_call_operand.vmem [shape: f32[1,32], index: 5, kind: input, shape index: {}]   ;;  %s2817_s6 = inlined_call_operand.hbm [shape: bf16[32,32], index: 6, kind: input, shape index: {}]   ;;  %s2818_s7 = inlined_call_operand.vmem [shape: f32[1,32], index: 7, kind: input, shape index: {}]   ;;  %s2819_s8 = inlined_call_operand.hbm [shape: bf16[4,8,32], index: 8, kind: input, shape index: {}]   ;;  %s2820_s9 = inlined_call_operand.vmem [shape: f32[1,32], index: 9, kind: input, shape index: {}]   ;;  %s2821_s10 = inlined_call_operand.hbm [shape: bf16[32,64], index: 10, kind: input, shape index: {}]   ;;  %s2822_s11 = inlined_call_operand.hbm [shape: bf16[32,64], index: 11, kind: input, shape index: {}]   ;;  %s2823_s12 = inlined_call_operand.vmem [shape: f32[1,64], index: 12, kind: input, shape index: {}]   ;;  %s2824_s13 = inlined_call_operand.vmem [shape: f32[1,64], index: 13, kind: input, shape index: {}]   ;;  %s2825_s14 = inlined_call_operand.vmem [shape: f32[1,64], index: 14, kind: input, shape index: {}]   ;;  %s2826_s15 = inlined_call_operand.vmem [shape: bf16[64,32], index: 15, kind: input, shape index: {}]   ;;  %s2827_s16 = inlined_call_operand.vmem [shape: f32[1,32], index: 16, kind: input, shape index: {}]   ;;  %s2828_s17 = inlined_call_operand.hbm [shape: f32[2,32,32], index: 17, kind: output, shape index: {}]  }
   0x1   :  { %2837 = sst [smem:[#allocation24_spill]] %s2811_s0 }
   0x2   :  { %2838 = sst [smem:[#allocation25_spill]] %s2812_s1 }
   0x3   :  { %2839 = sst [smem:[#allocation26_spill]] %s2813_s2 }
   0x4   :  { %2840 = sst [smem:[#allocation27_spill]] %s2814_s3 }
   0x5   :  { %2841 = sst [smem:[#allocation28_spill]] %s2815_s4 }
   0x6   :  { %2842 = sst [smem:[#allocation29_spill]] %s2816_s5 }
   0x7   :  { %2843 = sst [smem:[#allocation30_spill]] %s2817_s6 }
   0x8   :  { %2844 = sst [smem:[#allocation31_spill]] %s2818_s7 }
   0x9   :  { %2845 = sst [smem:[#allocation32_spill]] %s2819_s8 }
   0xa   :  { %2846 = sst [smem:[#allocation33_spill]] %s2820_s9 }
   0xb   :  { %2847 = sst [smem:[#allocation34_spill]] %s2821_s10 }
   0xc   :  { %2848 = sst [smem:[#allocation35_spill]] %s2822_s11 }
   0xd   :  { %2849 = sst [smem:[#allocation36_spill]] %s2823_s12 }
   0xe   :  { %2850 = sst [smem:[#allocation37_spill]] %s2824_s13 }
   0xf   :  { %2851 = sst [smem:[#allocation38_spill]] %s2825_s14 }
  0x10   :  { %2852 = sst [smem:[#allocation39_spill]] %s2826_s15 }
  0x11   :  { %2853 = sst [smem:[#allocation40_spill]] %s2827_s16 }
  0x12   :  { %2854 = sst [smem:[#allocation41_spill]] %s2828_s17 }
  0x13   :  { %22 = vsyncpa [#allocation5], 0 }
  0x14   :  { %24 = vsyncpa [#allocation5 + $0x1], 0 }
  0x15   :  { %25 = vsyncpa [#allocation8], 0 }
  0x16   :  { %26 = vsyncpa [#allocation11], 0 }
  0x17   :  { %27 = vsyncpa [#allocation14], 0 }
  0x18   :  { %28 = vsyncpa [#allocation6], 0 }
  0x19   :  { %30 = vsyncpa [#allocation6 + $0x1], 0  ;;  %s2389_s24 = smov 0   ;;  %s2391_s25 = smov 0  }
  0x1a   :  { %s2393_s26 = smov 0   ;;  %s2395_s27 = smov 0  }
  0x1b   :  { %s2397_s28 = smov 0   ;;  %s2399_s29 = smov 0  }
  0x1c   :  { %s2401_s0 = smov 0   ;;  %s2403_s30 = smov 0  }
  0x1d   :  { %s2405_s18 = smov 0   ;;  %s2407_s19 = smov 0  }
  0x1e   :  { %s2409_s1 = smov 0  }
  0x1f LB: > { %2855 = sst [smem:[#allocation21_spill]] %s2281_s19  ;;  %s1611_s20 = sadd.s32 4294967295, %s2285_s1   ;;  %s2285_s1 = sphi %s2409_s1, %s36_s1   ;;  %s2281_s19 = sphi %s2407_s19, %s2889_s19   ;;  %s2277_s18 = sphi %s2405_s18, %s2897_s18   ;;  %s2273_s30 = sphi %s2403_s30, %s2887_s30   ;;  %s2269_s0 = sphi %s2401_s0, %s2896_s0   ;;  %s2265_s29 = sphi %s2399_s29, %s2895_s29   ;;  %s2261_s28 = sphi %s2397_s28, %s2894_s28   ;;  %s2257_s27 = sphi %s2395_s27, %s2893_s27   ;;  %s2253_s26 = sphi %s2393_s26, %s2892_s26   ;;  %s2249_s25 = sphi %s2391_s25, %s2891_s25   ;;  %s2245_s24 = sphi %s2389_s24, %s2890_s24  }
  0x20   : > { %p1613_p0 = scmp.ge.s32.totalorder %s2285_s1, 1  ;;  %p2446_p1 = scmp.eq.s32.totalorder %s1611_s20, 0 }
  0x21   : > { %p2450_p2 = scmp.eq.s32.totalorder %s1611_s20, 3  ;;  %p450_p3 = scmp.lt.s32.totalorder %s2285_s1, 5 }
  0x22   : > { %s2858_s4 = sld [smem:[#allocation28_spill]]  ;;  %s2287_s13 = smov [#allocation7]  }
  0x23   : > { %p2458_p4 = pnand %p1613_p0, %p450_p3  ;;  %s469_s12 = sshll.u32 %s2287_s13, 4  ;;  %s470_s12 = int_to_ptr.vmem [resolvable:$true] %s469_s12 }
  0x24   : > { %s2861_s8 = sld [smem:[#allocation32_spill]]  ;;  %s2288_s23 = smov [#allocation10]  }
  0x25   : > { %p1795_p5 = pneg %p2458_p4  ;;  %s2832_s3 = smov 64  }
  0x26   : > { %s2833_s13 = smov 4   ;;  %s2862_s6 = sld [smem:[#allocation30_spill]] }
  0x27   : > { %p2466_p6 = pnand %p1795_p5, %p2446_p1  ;;  %s2291_s15 = smov [#allocation9]  }
  0x28   : > { %s467_s16 = sshll.u32 %s2858_s4, 4  ;;  %s503_s4 = sshll.u32 %s2288_s23, 4  ;;  %s468_s16 = int_to_ptr.hbm [resolvable:$true] %s467_s16  ;;  %s504_s4 = int_to_ptr.vmem [resolvable:$true] %s503_s4 }
  0x29   : > { %1798 = dma.hbm_to_vmem [thread:$0]  (!%p2466_p6), %s468_s16, 256, %s470_s12, [#allocation8], %s2832_s3, %s2832_s3, %s2833_s13  }
  0x2a   : > { %s501_s17 = sshll.u32 %s2861_s8, 4  ;;  %s486_s23 = sshll.u32 %s2291_s15, 4  ;;  %s502_s17 = int_to_ptr.hbm [resolvable:$true] %s501_s17  ;;  %s487_s23 = int_to_ptr.vmem [resolvable:$true] %s486_s23 }
  0x2b   : > { %1804 = dma.hbm_to_vmem [thread:$0]  (!%p2466_p6), %s502_s17, 256, %s504_s4, [#allocation11], %s2832_s3, %s2832_s3, %s2833_s13  }
  0x2c   : > { %s484_s9 = sshll.u32 %s2862_s6, 4  ;;  %s2863_s10 = sld [smem:[#allocation34_spill]]  ;;  %s485_s9 = int_to_ptr.hbm [resolvable:$true] %s484_s9 }
  0x2d   : > { %1801 = dma.hbm_to_vmem [thread:$0]  (!%p2466_p6), %s485_s9, 256, %s487_s23, [#allocation8], %s2832_s3, %s2832_s3, %s2833_s13  }
  0x2e   : > { %s2864_s11 = sld [smem:[#allocation35_spill]]  ;;  %s2292_s16 = smov [#allocation12]  }
  0x2f   : > { %s520_s5 = sshll.u32 %s2292_s16, 4  ;;  %s2293_s8 = smov [#allocation13]   ;;  %s521_s5 = int_to_ptr.vmem [resolvable:$true] %s520_s5 }
  0x30   : > { %s534_s17 = sshll.u32 %s2293_s8, 4  ;;  %s1612_s9 = sadd.s32 4294967294, %s2285_s1   ;;  %s535_s17 = int_to_ptr.vmem [resolvable:$true] %s534_s17 }
  0x31   : > { %s45_s15 = sadd.s32 1, %s2277_s18  ;;  %s48_s23 = sadd.s32 1, %s2281_s19 }
  0x32   : > { %s518_s12 = sshll.u32 %s2863_s10, 4  ;;  %p46_p7 = scmp.ge.s32.totalorder %s45_s15, 2  ;;  %s519_s12 = int_to_ptr.hbm [resolvable:$true] %s518_s12 }
  0x33   : > { %1807 = dma.hbm_to_vmem [thread:$0]  (!%p2466_p6), %s519_s12, 256, %s521_s5, [#allocation11], %s2832_s3, %s2832_s3, %s2833_s13  }
  0x34   : > { %s532_s7 = sshll.u32 %s2864_s11, 4  ;;  %s83_s12 = sadd.s32 1, %s2265_s29  ;;  %s533_s7 = int_to_ptr.hbm [resolvable:$true] %s532_s7 }
  0x35   : > { %1810 = dma.hbm_to_vmem [thread:$0]  (!%p2466_p6), %s533_s7, 256, %s535_s17, [#allocation14], %s2832_s3, %s2832_s3, %s2833_s13  }
  0x36   : > { %p90_p8 = scmp.ne.s32.totalorder %s2265_s29, %s2261_s28  ;;  %s2899_s15 = smov (%p46_p7, %s45_s15), 0 }
  0x37   : > { %2865 = sst [smem:[#allocation22_spill]] %s2899_s15  ;;  %s2901_s23 = smov (!%p46_p7, %s48_s23), %s2281_s19 }
  0x38   : > { %p91_p9 = scmp.eq.s32.totalorder %s2285_s1, 0  ;;  %p96_p10 = scmp.ne.s32.totalorder %s2261_s28, %s2257_s27 }
  0x39   : > { %p50_p11 = scmp.ge.s32.totalorder %s2901_s23, 2  ;;  %s422_s20 = ssub.s32 %s2277_s18, %s2899_s15 }
  0x3a   : > { %p2521_p12 = por %p91_p9, %p90_p8  ;;  %p2527_p13 = por %p2446_p1, %p96_p10 }
  0x3b   : > { %s2903_s23 = smov (%p50_p11, %s2901_s23), 0  ;;  %s426_s7 = sadd.s32 1, %s2253_s26 }
  0x3c   : > { %2868 = sst [smem:[#allocation23_spill]] %s2903_s23  ;;  %p436_p0 = scmp.ne.s32.totalorder %s2253_s26, %s2249_s25 }
  0x3d   : > { %s80_s27 = ssub.s32 %s2281_s19, %s2903_s23  ;;  %p442_p3 = scmp.ne.s32.totalorder %s2249_s25, %s2245_s24 }
  0x3e   : > { %p81_p5 = scmp.eq.s32.totalorder %s80_s27, 0  ;;  %s423_s16 = sor.u32 %s422_s20, %s80_s27 }
  0x3f   : > { %p424_p6 = scmp.eq.s32.totalorder %s423_s16, 0  ;;  %p2542_p7 = por %p2450_p2, %p436_p0 }
  0x40   : > { %s2547_s8 = scalar_select %p81_p5, %s2265_s29, %s83_s12  }
  0x41   : > { %s2550_s17 = scalar_select %p424_p6, %s2253_s26, %s426_s7  }
  0x42   : > { %p443_p8 = scmp.eq.s32.totalorder %s1612_s9, 3  ;;  %p1824_p9 = scmp.lt.s32.totalorder %s2285_s1, 4 }
  0x43   : > { %s576_s3 = sand.u32 1, %s2265_s29   ;;  %s1745_s13 = sshll.u32 %s2281_s19, 4 }
  0x44   : > { %p2555_p10 = por %p443_p8, %p442_p3  ;;  %s1620_s20 = sshll.u32 %s576_s3, 4 }
  0x45   : > { %s2871_s16 = sld [smem:[#allocation25_spill]]  ;;  %s580_s23 = scalar_lea.vmem [#allocation4], %s1620_s20 }
  0x46   : > { %s588_s12 = sshll.u32 %s580_s23, 4  ;;  %p1812_p2 = pnand %p1824_p9, %p2521_p12  ;;  %s589_s12 = int_to_ptr.vmem [resolvable:$true] %s588_s12 }
  0x47   : > { %s577_s9 = scalar_lea.sflag [#allocation5], %s576_s3  ;;  %s2872_s7 = smov 4  }
  0x48   : > { %s2873_s15 = smov 64   ;;  %s602_s19 = sand.u32 (!%p2458_p4), 1, %s2261_s28  }
  0x49   : > { %600 = sbr.rel (%p2458_p4) target bundleno = 1935 (0x78f), region = 88  ;;  %s2570_s27 = sshll.u32 (!%p2458_p4), %s602_s19, 4 }
  0x4b   : > { %s585_s10 = scalar_lea.hbm %s2871_s16, %s1745_s13  ;;  %s606_s13 = scalar_lea.vmem (!%p2458_p4), [#allocation4], %s2570_s27 }
  0x4c   : > { %s586_s11 = sshll.u32 %s585_s10, 4  ;;  %s603_s10 = scalar_lea.sflag (!%p2458_p4), [#allocation5], %s602_s19  ;;  %s587_s11 = int_to_ptr.hbm [resolvable:$true] %s586_s11 }
  0x4d   : > { %1814 = dma.hbm_to_vmem [thread:$0]  (!%p1812_p2), %s587_s11, 256, %s589_s12, %s577_s9, %s2873_s15, %s2873_s15, %s2872_s7  }
  0x4e   : > { %2224 = dma.done.wait (%p2527_p13), %s603_s10, 256  }
  0x4f   : > { %2226 = vsyncadd (%p2527_p13), %s603_s10, 4294967040 }
  0x50   : > { %2228 = dma.done.wait (%p2446_p1), [#allocation8], 512  }
  0x51   : > { %2230 = vsyncadd (%p2446_p1), [#allocation8], 4294966784 }
  0x52   : > { %2232 = dma.done.wait (%p2446_p1), [#allocation11], 512  }
  0x53   : > { %2234 = vsyncadd (%p2446_p1), [#allocation11], 4294966784 }
  0x54   : > { %2236 = dma.done.wait (%p2446_p1), [#allocation14], 256  }
  0x55   : > { %2238 = vsyncadd (%p2446_p1), [#allocation14], 4294967040  ;;  %s689_s3 = sand.u32 1, %s2249_s25   ;;  %s2591_s11 = sshll.u32 %s2269_s0, 1 }
  0x56   : > { %s1630_s14 = sshll.u32 %s689_s3, 4  ;;  %p693_p4 = scmp.lt.s32.totalorder %s2273_s30, 1 }
  0x57   : > { %p695_p11 = scmp.lt.s32.totalorder %s2591_s11, 3  ;;  %s2874_s22 = sld [smem:[#allocation24_spill]] }
  0x58   : > { %s694_s19 = scalar_select %p693_p4, %s2273_s30, 1 }
  0x59   : > { %s696_s15 = scalar_select %p695_p11, %s2591_s11, 3 }
  0x5a   : > { %s1632_s23 = sshll.u32 %s694_s19, 2  ;;  %s2604_s12 = scalar_lea.vmem [#allocation15], %s1630_s14 }
  0x5b   : > { %s698_s2 = sadd.s32 %s1632_s23, %s696_s15  ;;  %p1634_p1 = scmp.ne.s32.totalorder %s2269_s0, 0 }
  0x5c   : > { %s1633_s21 = sshll.u32 %s698_s2, 2  ;;  %s2875_s7 = sld [smem:[#allocation29_spill]] (!%p1634_p1) }
  0x5d   : > { %s2602_s16 = scalar_lea.vmem %s2874_s22, %s1633_s21  ;;  %707 = sbr.rel (%p1634_p1) target bundleno = 252 (0xfc), region = 116 }
  0x5e   : > { %s2876_s19 = sld [smem:[#allocation31_spill]] (!%p1634_p1) }
  0x62   : > { %v1749_v0 = vld [vmem:[#allocation7 + $0x8] sm:$0xff]  ;;  %v1751_v1 = vld [vmem:[#allocation9 + $0x8] sm:$0xff]  ;;  %v1748_v2 = vld [vmem:[#allocation7] sm:$0xff]  ;;  %vm742_vm0 = vcmask 261120   ;;  %vm811_vm1 = vcmask 257024  }
  0x63   : > { %755 = vmatpush.bf16.msra.mxu0 %v1749_v0  ;;  %1767 = vmatpush.bf16.msra.mxu2 %v1749_v0  ;;  %v1750_v3 = vld [vmem:[#allocation9] sm:$0xff]  ;;  %v1747_v5 = vld [vmem:[%s606_s13 + $0x8] sm:$0xff]  ;;  %v1931_v6 = vld [vmem:[%s2875_s7] ss:$0 sm:$0xff] }
  0x64   : > { %794 = vmatpush.bf16.msra.mxu1 %v1751_v1  ;;  %1769 = vmatpush.bf16.msra.mxu3 %v1751_v1  ;;  %v1746_v4 = vld [vmem:[%s606_s13] sm:$0xff] }
  0x65   : > { %v1932_v7 = vld [vmem:[%s2876_s19] ss:$0 sm:$0xff] }
  0x67   : > { %756 = vmatpush.bf16.msra.mxu0 %v1748_v2  ;;  %1768 = vmatpush.bf16.msra.mxu2 %v1748_v2 }
  0x68   : > { %795 = vmatpush.bf16.msra.mxu1 %v1750_v3  ;;  %1770 = vmatpush.bf16.msra.mxu3 %v1750_v3 }
  0x6a   : > { %1651 = vmatmul.msk.bf16.vlgmr.msra.gmra.mxu0 %vm742_vm0, %v1746_v4  ;;  %1652 = vmatmul.msk.bf16.vlgmr.msra.gmra.mxu2 %vm742_vm0, %v1747_v5 }
  0x6b   : > { %1661 = vmatmul.msk.bf16.vlgmr.msra.gmra.mxu1 %vm742_vm0, %v1746_v4  ;;  %1662 = vmatmul.msk.bf16.vlgmr.msra.gmra.mxu3 %vm742_vm0, %v1747_v5 }
  0xe7   : > { %v758_v8 = vpop.f32.mrf.mxu0 }
  0xe8   : > { %v759_v9 = vadd.f32 %v1931_v6, %v758_v8  ;;  %v797_v10 = vpop.f32.mrf.mxu1 }
  0xe9   : > { %v798_v11 = vadd.f32 %v1932_v7, %v797_v10 }
  0xea   : > { %v807_v12 = vpack.c.bf16 %v759_v9, %v759_v9 }
  0xeb   : > { %v816_v13 = vpack.c.bf16 %v798_v11, %v798_v11 }
  0xec   : > { %812 = vst.msk [vmem:[#allocation2] sm:$0xf] %vm811_vm1, %v807_v12 }
  0xed   : > { %820 = vst.msk [vmem:[#allocation3] sm:$0xf] %vm811_vm1, %v816_v13  ;;  %v763_v14 = vpop.f32.mrf.mxu2 }
  0xee   : > { %v764_v15 = vadd.f32 %v1931_v6, %v763_v14  ;;  %v802_v16 = vpop.f32.mrf.mxu3 }
  0xef   : > { %v803_v17 = vadd.f32 %v1932_v7, %v802_v16  ;;  %v760_v18 = vpop.f32.mrf.mxu0 }
  0xf0   : > { %v809_v19 = vpack.c.bf16 %v764_v15, %v764_v15  ;;  %v761_v20 = vadd.f32 %v1931_v6, %v760_v18  ;;  %v799_v21 = vpop.f32.mrf.mxu1 }
  0xf1   : > { %v818_v22 = vpack.c.bf16 %v803_v17, %v803_v17  ;;  %v800_v23 = vadd.f32 %v1932_v7, %v799_v21 }
  0xf2   : > { %814 = vst.msk [vmem:[#allocation2 + $0x8] sm:$0xf] %vm811_vm1, %v809_v19  ;;  %v808_v24 = vpack.c.bf16 %v761_v20, %v761_v20 }
  0xf3   : > { %822 = vst.msk [vmem:[#allocation3 + $0x8] sm:$0xf] %vm811_vm1, %v818_v22  ;;  %v817_v25 = vpack.c.bf16 %v800_v23, %v800_v23 }
  0xf4   : > { %813 = vst.msk [vmem:[#allocation2 + $0x4] sm:$0xf] %vm811_vm1, %v808_v24 }
  0xf5   : > { %821 = vst.msk [vmem:[#allocation3 + $0x4] sm:$0xf] %vm811_vm1, %v817_v25  ;;  %v765_v26 = vpop.f32.mrf.mxu2 }
  0xf6   : > { %v766_v27 = vadd.f32 %v1931_v6, %v765_v26  ;;  %v804_v28 = vpop.f32.mrf.mxu3 }
  0xf7   : > { %v805_v29 = vadd.f32 %v1932_v7, %v804_v28 }
  0xf8   : > { %v810_v30 = vpack.c.bf16 %v766_v27, %v766_v27 }
  0xf9   : > { %v819_v31 = vpack.c.bf16 %v805_v29, %v805_v29 }
  0xfa   : > { %815 = vst.msk [vmem:[#allocation2 + $0xc] sm:$0xf] %vm811_vm1, %v810_v30 }
  0xfb   : > { %823 = vst.msk [vmem:[#allocation3 + $0xc] sm:$0xf] %vm811_vm1, %v819_v31 }
  0xfc PF: > { %s2877_s15 = sld [smem:[#allocation26_spill]]  ;;  %s2294_s21 = smov 120   ;;  %v2636_v35 = vld [vmem:[%s2602_s16] sm:$0xff]  ;;  %vm851_vm2 = vcmask 261120   ;;  %vm896_vm3 = vcmask 64512   ;;  %v2667_v7 = vld [vmem:[#allocation3] sm:$0xff] }
  0xfd   : > { %v1755_v36 = vld [vmem:[#allocation2] sm:$0xff]  ;;  %s2295_s4 = smov 112   ;;  %s2296_s20 = smov 104   ;;  %vm1055_vm4 = vcmask 1043456   ;;  %vm1420_vm5 = vcmask 523264  }
  0xfe   : > { %v901_v38 = vsel %vm896_vm3, %v1755_v36, 0  ;;  %s2878_s0 = sld [smem:[#allocation27_spill]]  ;;  %v973_v17 = vld [vmem:[#allocation10] sm:$0xf]  ;;  %s1741_s2 = sshll.u32 %s2273_s30, 2 }
  0xff   : > { %v1077_v19 = vsel %vm1055_vm4, %v973_v17, 0  ;;  %s2879_s10 = sld [smem:[#allocation33_spill]]  ;;  %s1441_s30 = scalar_lea.sflag [#allocation6], %s689_s3 }
 0x100   : > { %s2880_s27 = sld [smem:[#allocation39_spill]] }
 0x101   : > { %v2628_v33 = vld [vmem:[#allocation2 + $0x8] sm:$0xff]  ;;  %s2882_s9 = sld [smem:[#allocation36_spill]] }
 0x102   : > { %v1754_v32 = vld [vmem:[%s2877_s15 + $0x8] sm:$0xff]  ;;  %v1753_v34 = vld [vmem:[%s2877_s15] sm:$0xff]  ;;  %978 = vrot.lane.b32.xlu2 %v2628_v33, %s2294_s21  ;;  %v904_v37 = vsel %vm896_vm3, %v2628_v33, 0  ;;  %v2664_v6 = vld [vmem:[#allocation3 + $0x8] sm:$0xff]  ;;  %s2883_s14 = sld [smem:[#allocation37_spill]] }
 0x103   : > { %861 = vmatpush.bf16.msra.mxu0 %v1754_v32  ;;  %912 = vmatpush.bf16.xpose.msra.mxu1 %v904_v37  ;;  %s2884_s23 = sld [smem:[#allocation38_spill]] }
 0x104   : > { %v1933_v39 = vld [vmem:[%s2878_s0] ss:$0 sm:$0xff]  ;;  %964 = vmatpush.bf16.msra.mxu2 %v2664_v6  ;;  %s2885_s22 = sld [smem:[#allocation40_spill]] }
 0x105   : > { %s2886_s7 = sld [smem:[#allocation41_spill]] }
 0x106   : > { %s2881_s13 = smov %s2880_s27 }
 0x107   : > { %862 = vmatpush.bf16.msra.mxu0 %v1753_v34 }
 0x108   : > { %965 = vmatpush.bf16.msra.mxu2 %v2667_v7 }
 0x10a   : > { %1675 = vmatmul.msk.bf16.vlgmr.msra.gmra.mxu0 %vm851_vm2, %v2636_v35  ;;  %976 = vrot.lane.b32.xlu2 %v1755_v36, %s2294_s21 }
 0x10b   : > { %913 = vmatpush.bf16.xpose.msra.mxu1 %v901_v38 }
 0x112   : > { %1095 = vrot.lane.b32.xlu2 %v1755_v36, %s2295_s4 }
 0x113   : > { %1086 = vmatpush.bf16.msrb.mxu1 %v1077_v19 }
 0x11a   : > { %1197 = vrot.lane.b32.xlu2 %v2628_v33, %s2296_s20 }
 0x15c   : > { %v979_v55 = vpop.permute.xlu2 %978 }
 0x15d   : > { %v987_v56 = vsel %vm896_vm3, %v979_v55, 0 }
 0x15e   : > { %995 = vmatpush.bf16.xpose.msra.mxu3 %v987_v56 }
 0x164   : > { %v977_v57 = vpop.permute.xlu2 %976 }
 0x165   : > { %v984_v58 = vsel %vm896_vm3, %v977_v57, 0 }
 0x166   : > { %996 = vmatpush.bf16.xpose.msra.mxu3 %v984_v58 }
 0x16c   : > { %v1096_v9 = vpop.permute.xlu2 %1095 }
 0x16d   : > { %v1103_v25 = vsel %vm896_vm3, %v1096_v9, 0 }
 0x174   : > { %v1198_v13 = vpop.permute.xlu2 %1197 }
 0x175   : > { %v1206_v16 = vsel %vm896_vm3, %v1198_v13, 0 }
 0x187   : > { %v864_v40 = vpop.f32.mrf.mxu0 }
 0x188   : > { %v865_v41 = vadd.f32 %v1933_v39, %v864_v40 }
 0x18a   : > { %v869_v42 = vmul.f32 0.35355338, %v865_v41 }
 0x18c   : > { %v871_v45 = vpack.c.bf16 %v869_v42, %v869_v42 }
 0x18e   : > { %v883_v48 = vunpack.c.l.b16 %v871_v45 }
 0x18f   : > { %v866_v43 = vpop.f32.mrf.mxu0 }
 0x190   : > { %v867_v44 = vadd.f32 %v1933_v39, %v866_v43 }
 0x192   : > { %v870_v46 = vmul.f32 0.35355338, %v867_v44 }
 0x194   : > { %v872_v47 = vpack.c.bf16 %v870_v46, %v870_v46 }
 0x196   : > { %v884_v49 = vunpack.c.l.b16 %v872_v47 }
 0x198   : > { %v885_v50 = vpack.c.b16 %v884_v49, %v883_v48 }
 0x19a   : > { %1093 = vrot.lane.b32.xlu2 %v885_v50, %s2295_s4  ;;  %1684 = vmatmul.msk.bf16.vlgmr.msra.gmra.mxu1 %vm896_vm3, %v885_v50 }
 0x19b   : > { %1214 = vmatpush.bf16.xpose.msra.mxu1 %v1206_v16 }
 0x1a2   : > { %1193 = vrot.lane.b32.xlu2 %v885_v50, %s2296_s20 }
 0x1f4   : > { %v1094_v27 = vpop.permute.xlu2 %1093 }
 0x1fc   : > { %v1194_v39 = vpop.permute.xlu2 %1193 }
 0x217   : > { %v915_v51 = vpop.f32.mrf.mxu1 }
 0x218   : > { %v920_v52 = vsel %vm851_vm2, %v915_v51, -inf }
 0x219   : > { %921 = vmax.xlane.f32.xlu0 %v920_v52 }
 0x21f   : > { %v917_v53 = vpop.f32.mrf.mxu1 }
 0x220   : > { %v923_v54 = vsel %vm851_vm2, %v917_v53, -inf }
 0x221   : > { %924 = vmax.xlane.f32.xlu0 %v923_v54 }
 0x235   : > { %974 = vrot.lane.b32.xlu0 %v885_v50, %s2294_s21 }
 0x23d   : > { %1195 = vrot.lane.b32.xlu0 %v1755_v36, %s2296_s20 }
 0x28c   : > { %v922_v59 = vpop.xlane.xlu0 %921 }
 0x28d   : > { %v926_v60 = vsub.f32 %v915_v51, %v922_v59 }
 0x28f   : > { %v928_v61 = vmul.f32 1.442695, %v926_v60 }
 0x291   : > { %1939 = vpow2.f32 %v928_v61 }
 0x294   : > { %v925_v62 = vpop.xlane.xlu0 %924 }
 0x295   : > { %v927_v63 = vsub.f32 %v917_v53, %v925_v62 }
 0x297   : > { %v1940_v0 = vpop.eup %1939  ;;  %v930_v1 = vmul.f32 1.442695, %v927_v63 }
 0x298   : > { %v932_v2 = vsel %vm851_vm2, %v1940_v0, 0.0 }
 0x299   : > { %1941 = vpow2.f32 %v930_v1  ;;  %933 = vadd.xlane.f32.xlu1 %v932_v2 }
 0x29f   : > { %v1942_v3 = vpop.eup %1941 }
 0x2a0   : > { %v935_v4 = vsel %vm851_vm2, %v1942_v3, 0.0 }
 0x2a1   : > { %936 = vadd.xlane.f32.xlu1 %v935_v4 }
 0x2a7   : > { %v975_v5 = vpop.permute.xlu0 %974 }
 0x2a8   : > { %1694 = vmatmul.msk.bf16.vlgmr.msra.gmra.mxu3 %vm896_vm3, %v975_v5 }
 0x2af   : > { %v1196_v28 = vpop.permute.xlu0 %1195 }
 0x2b0   : > { %v1203_v29 = vsel %vm896_vm3, %v1196_v28, 0 }
 0x2b1   : > { %1215 = vmatpush.bf16.xpose.msra.mxu1 %v1203_v29 }
 0x2ba   : > { %1097 = vrot.lane.b32.xlu1 %v2628_v33, %s2295_s4 }
 0x30c   : > { %v934_v8 = vpop.xlane.xlu1 %933 }
 0x30d   : > { %1943 = vrcp.f32 %v934_v8 }
 0x313   : > { %v1944_v11 = vpop.eup %1943 }
 0x314   : > { %v937_v10 = vpop.xlane.xlu1 %936  ;;  %v940_v14 = vmul.f32 %v1944_v11, %v1940_v0 }
 0x315   : > { %1945 = vrcp.f32 %v937_v10 }
 0x31b   : > { %v1946_v12 = vpop.eup %1945 }
 0x31c   : > { %v941_v15 = vmul.f32 %v1946_v12, %v1942_v3 }
 0x31e   : > { %v942_v18 = vpack.c.bf16 %v941_v15, %v940_v14 }
 0x320   : > { %1693 = vmatmul.msk.bf16.vlgmr.msra.gmra.mxu2 %vm851_vm2, %v942_v18 }
 0x32b   : > { %v998_v20 = vpop.f32.mrf.mxu3 }
 0x32c   : > { %v1098_v21 = vpop.permute.xlu1 %1097  ;;  %v1003_v22 = vsel %vm851_vm2, %v998_v20, -inf }
 0x32d   : > { %1004 = vmax.xlane.f32.xlu1 %v1003_v22  ;;  %v1106_v23 = vsel %vm896_vm3, %v1098_v21, 0 }
 0x32e   : > { %1114 = vmatpush.bf16.xpose.msrb.mxu3 %v1106_v23 }
 0x333   : > { %v1000_v24 = vpop.f32.mrf.mxu3 }
 0x334   : > { %v1006_v26 = vsel %vm851_vm2, %v1000_v24, -inf }
 0x335   : > { %1007 = vmax.xlane.f32.xlu0 %v1006_v26 }
 0x336   : > { %1115 = vmatpush.bf16.xpose.msrb.mxu3 %v1103_v25 }
 0x33d   : > { %1698 = vmatmul.msk.bf16.vlgmr.msrb.gmra.mxu3 %vm896_vm3, %v1094_v27 }
 0x3a0   : > { %v1005_v40 = vpop.xlane.xlu1 %1004 }
 0x3a1   : > { %v1009_v41 = vsub.f32 %v998_v20, %v1005_v40 }
 0x3a3   : > { %v967_v30 = vpop.f32.mrf.mxu2  ;;  %v1011_v44 = vmul.f32 1.442695, %v1009_v41 }
 0x3a8   : > { %v1008_v31 = vpop.xlane.xlu0 %1007 }
 0x3a9   : > { %v1010_v32 = vsub.f32 %v1000_v24, %v1008_v31 }
 0x3ab   : > { %v1013_v33 = vmul.f32 1.442695, %v1010_v32  ;;  %v969_v34 = vpop.f32.mrf.mxu2 }
 0x3ac   : > { %v972_v36 = vpack.c.bf16 %v969_v34, %v967_v30  ;;  %v1051_v30 = vld [vmem:[#allocation10 + $0x4] sm:$0xf]  ;;  %v1170_v34 = vld [vmem:[#allocation10 + $0x8] sm:$0xf] }
 0x3ad   : > { %1947 = vpow2.f32 %v1013_v33  ;;  %v1057_v31 = vsel %vm1055_vm4, %v1051_v30, 0 }
 0x3ae   : > { %1697 = vmatmul.msk.bf16.vlgmr.msrb.gmra.mxu1 %vm896_vm3, %v972_v36  ;;  %1949 = vpow2.f32 %v1011_v44  ;;  %1066 = vmatpush.bf16.msrb.mxu2 %v1057_v31  ;;  %v1175_v36 = vsel %vm1055_vm4, %v1170_v34, 0 }
 0x3b2   : > { %1184 = vmatpush.bf16.msra.mxu2 %v1175_v36 }
 0x3b3   : > { %v2680_v37 = vpop.eup %1947 }
 0x3b4   : > { %v1018_v38 = vsel %vm851_vm2, %v2680_v37, 0.0  ;;  %v1950_v47 = vpop.eup %1949 }
 0x3b5   : > { %1019 = vadd.xlane.f32.xlu0 %v1018_v38  ;;  %v1015_v48 = vsel %vm851_vm2, %v1950_v47, 0.0 }
 0x3be   : > { %1701 = vmatmul.msk.bf16.vlgmr.msra.gmra.mxu1 %vm896_vm3, %v1194_v39 }
 0x3c0   : > { %v1117_v42 = vpop.f32.mrf.mxu3 }
 0x3c1   : > { %v1122_v43 = vsel %vm851_vm2, %v1117_v42, -inf }
 0x3c2   : > { %1123 = vmax.xlane.f32.xlu2 %v1122_v43 }
 0x3c8   : > { %v1119_v45 = vpop.f32.mrf.mxu3 }
 0x3c9   : > { %v1125_v46 = vsel %vm851_vm2, %v1119_v45, -inf }
 0x3ca   : > { %1126 = vmax.xlane.f32.xlu1 %v1125_v46 }
 0x3d2   : > { %1016 = vadd.xlane.f32.xlu1 %v1015_v48 }
 0x3eb   : > { %1026 = vrot.lane.b32.xlu1 %v2667_v7, %s2294_s21 }
 0x3f3   : > { %1147 = vrot.lane.b32.xlu1 %v2664_v6, %s2295_s4 }
 0x3fb   : > { %1145 = vrot.lane.b32.xlu1 %v2667_v7, %s2295_s4 }
 0x403   : > { %1245 = vrot.lane.b32.xlu1 %v2667_v7, %s2296_s20 }
 0x428   : > { %v1020_v1 = vpop.xlane.xlu0 %1019 }
 0x42b   : > { %v2696_v49 = vpop.f32.mrf.mxu1 }
 0x433   : > { %v2698_v50 = vpop.f32.mrf.mxu1 }
 0x435   : > { %v1124_v51 = vpop.xlane.xlu2 %1123 }
 0x436   : > { %v1128_v52 = vsub.f32 %v1117_v42, %v1124_v51  ;;  %v1270_v51 = vld [vmem:[#allocation10 + $0xc] sm:$0xf] }
 0x438   : > { %v1130_v53 = vmul.f32 1.442695, %v1128_v52  ;;  %v1275_v52 = vsel %vm1055_vm4, %v1270_v51, 0 }
 0x43a   : > { %1951 = vpow2.f32 %v1130_v53 }
 0x43b   : > { %v1217_v54 = vpop.f32.mrf.mxu1 }
 0x43c   : > { %v1222_v55 = vsel %vm851_vm2, %v1217_v54, -inf }
 0x43d   : > { %v1127_v56 = vpop.xlane.xlu1 %1126  ;;  %1223 = vmax.xlane.f32.xlu0 %v1222_v55 }
 0x43e   : > { %v1129_v57 = vsub.f32 %v1119_v45, %v1127_v56  ;;  %v1760_v56 = vld [vmem:[#allocation12 + $0x8] sm:$0xff] }
 0x43f   : > { %1355 = vmatpush.bf16.msrb.mxu1 %v1760_v56 }
 0x440   : > { %v1132_v58 = vmul.f32 1.442695, %v1129_v57  ;;  %v1952_v59 = vpop.eup %1951 }
 0x441   : > { %v1134_v62 = vsel %vm851_vm2, %v1952_v59, 0.0 }
 0x442   : > { %1953 = vpow2.f32 %v1132_v58  ;;  %v1762_v58 = vld [vmem:[#allocation13 + $0x8] sm:$0xff] }
 0x443   : > { %v1219_v60 = vpop.f32.mrf.mxu1 }
 0x444   : > { %v1225_v61 = vsel %vm851_vm2, %v1219_v60, -inf }
 0x445   : > { %1226 = vmax.xlane.f32.xlu2 %v1225_v61  ;;  %1135 = vadd.xlane.f32.xlu0 %v1134_v62  ;;  %v1017_v2 = vpop.xlane.xlu1 %1016 }
 0x448   : > { %v1954_v63 = vpop.eup %1953 }
 0x449   : > { %v1137_v0 = vsel %vm851_vm2, %v1954_v63, 0.0 }
 0x44d   : > { %1138 = vadd.xlane.f32.xlu0 %v1137_v0 }
 0x45d   : > { %1028 = vrot.lane.b32.xlu2 %v2664_v6, %s2294_s21  ;;  %v1027_v7 = vpop.permute.xlu1 %1026  ;;  %s1452_s21 = sadd.s32 %s1741_s2, %s2591_s11 }
 0x45e   : > { %s1742_s16 = sshll.u32 %s1452_s21, 3  ;;  %s2171_s21 = scalar_lea.hbm %s2886_s7, 64 }
 0x465   : > { %v1148_v14 = vpop.permute.xlu1 %1147 }
 0x46d   : > { %v1146_v24 = vpop.permute.xlu1 %1145 }
 0x475   : > { %v1246_v41 = vpop.permute.xlu1 %1245 }
 0x4b0   : > { %v1224_v3 = vpop.xlane.xlu0 %1223 }
 0x4b1   : > { %v1228_v4 = vsub.f32 %v1217_v54, %v1224_v3 }
 0x4b3   : > { %v1230_v5 = vmul.f32 1.442695, %v1228_v4 }
 0x4b5   : > { %1955 = vpow2.f32 %v1230_v5 }
 0x4b6   : > { %1957 = vrcp.f32 %v1017_v2 }
 0x4b7   : > { %1959 = vrcp.f32 %v1020_v1 }
 0x4b8   : > { %v1227_v8 = vpop.xlane.xlu2 %1226  ;;  %v1136_v12 = vpop.xlane.xlu0 %1135 }
 0x4b9   : > { %v1229_v9 = vsub.f32 %v1219_v60, %v1227_v8  ;;  %v1761_v60 = vld [vmem:[#allocation13] sm:$0xff] }
 0x4bb   : > { %v1956_v10 = vpop.eup %1955  ;;  %v1232_v11 = vmul.f32 1.442695, %v1229_v9 }
 0x4bc   : > { %v1234_v13 = vsel %vm851_vm2, %v1956_v10, 0.0  ;;  %v1958_v15 = vpop.eup %1957 }
 0x4bd   : > { %1961 = vpow2.f32 %v1232_v11  ;;  %1235 = vadd.xlane.f32.xlu0 %v1234_v13  ;;  %v1960_v17 = vpop.eup %1959  ;;  %v1023_v18 = vmul.f32 %v1958_v15, %v1950_v47  ;;  %v1763_v13 = vld [vmem:[%s2881_s13] sm:$0xff] }
 0x4be   : > { %v1024_v20 = vmul.f32 %v1960_v17, %v2680_v37  ;;  %v1935_v17 = vld [vmem:[%s2882_s9] ss:$0 sm:$0xff] }
 0x4c0   : > { %v1029_v16 = vpop.permute.xlu2 %1028  ;;  %v1139_v22 = vpop.xlane.xlu0 %1138  ;;  %v1025_v23 = vpack.c.bf16 %v1024_v20, %v1023_v18 }
 0x4c1   : > { %1041 = vmatpush.bf16.msrb.mxu0 %v1029_v16  ;;  %1963 = vrcp.f32 %v1139_v22 }
 0x4c2   : > { %1965 = vrcp.f32 %v1136_v12  ;;  %v1764_v12 = vld [vmem:[%s2881_s13 + $0x8] sm:$0xff] }
 0x4c3   : > { %v1962_v19 = vpop.eup %1961 }
 0x4c4   : > { %v1237_v21 = vsel %vm851_vm2, %v1962_v19, 0.0 }
 0x4c5   : > { %1238 = vadd.xlane.f32.xlu2 %v1237_v21  ;;  %1042 = vmatpush.bf16.msrb.mxu0 %v1027_v7  ;;  %v1934_v7 = vld [vmem:[%s2879_s10] ss:$0 sm:$0xff]  ;;  %s1454_s10 = scalar_lea.hbm %s2886_s7, %s1742_s16 }
 0x4c6   : > { %s1457_s19 = sshll.u32 %s1454_s10, 4  ;;  %s1458_s19 = int_to_ptr.hbm [resolvable:$true] %s1457_s19 }
 0x4c7   : > { %v1964_v25 = vpop.eup %1963  ;;  %s2165_s11 = sshra.s32 %s1458_s19, 4  ;;  %s2166_s11 = int_to_ptr.hbm [resolvable:$true] %s2165_s11 }
 0x4c8   : > { %1695 = vmatmul.msk.bf16.vlgmr.msrb.gmra.mxu0 %vm851_vm2, %v1025_v23  ;;  %v1966_v26 = vpop.eup %1965  ;;  %v1143_v27 = vmul.f32 %v1964_v25, %v1954_v63  ;;  %v1937_v23 = vld [vmem:[%s2884_s23] ss:$0 sm:$0xff]  ;;  %p2172_p3 = scmp.lt.s32.totalorder %s2166_s11, %s2886_s7 }
 0x4c9   : > { %1160 = vmatpush.bf16.msra.mxu0 %v1148_v14  ;;  %v1142_v28 = vmul.f32 %v1966_v26, %v1952_v59  ;;  %v1759_v59 = vld [vmem:[#allocation12] sm:$0xff] }
 0x4ca   : > { %1356 = vmatpush.bf16.msrb.mxu1 %v1759_v59 }
 0x4cb   : > { %v1144_v29 = vpack.c.bf16 %v1143_v27, %v1142_v28 }
 0x4cd   : > { %1161 = vmatpush.bf16.msra.mxu0 %v1146_v24  ;;  %1721 = vmatmul.msk.bf16.vlgmr.msrb.gmra.mxu1 %vm851_vm2, %v2636_v35 }
 0x4d1   : > { %1247 = vrot.lane.b32.xlu0 %v2664_v6, %s2296_s20  ;;  %1284 = vmatpush.bf16.msrb.mxu0 %v1275_v52 }
 0x4d8   : > { %1699 = vmatmul.msk.bf16.vlgmr.msra.gmra.mxu0 %vm851_vm2, %v1144_v29 }
 0x530   : > { %v1236_v33 = vpop.xlane.xlu0 %1235 }
 0x538   : > { %v1239_v32 = vpop.xlane.xlu2 %1238 }
 0x539   : > { %1967 = vrcp.f32 %v1239_v32  ;;  %v1938_v32 = vld [vmem:[%s2885_s22] ss:$0 sm:$0xff] }
 0x53a   : > { %1969 = vrcp.f32 %v1236_v33 }
 0x53f   : > { %v1968_v37 = vpop.eup %1967 }
 0x540   : > { %v1970_v6 = vpop.eup %1969  ;;  %v1243_v39 = vmul.f32 %v1968_v37, %v1962_v19  ;;  %v1936_v19 = vld [vmem:[%s2883_s14] ss:$0 sm:$0xff]  ;;  %s1455_s14 = sshll.u32 %s2604_s12, 4  ;;  %s1456_s14 = int_to_ptr.vmem [resolvable:$true] %s1455_s14 }
 0x541   : > { %v1242_v42 = vmul.f32 %v1970_v6, %v1956_v10 }
 0x543   : > { %v1248_v38 = vpop.permute.xlu0 %1247  ;;  %v1244_v43 = vpack.c.bf16 %v1243_v39, %v1242_v42 }
 0x544   : > { %1260 = vmatpush.bf16.msra.mxu3 %v1248_v38 }
 0x545   : > { %v1044_v40 = vpop.f32.mrf.mxu0 }
 0x548   : > { %1261 = vmatpush.bf16.msra.mxu3 %v1246_v41 }
 0x54a   : > { %v1358_v14 = vpop.f32.mrf.mxu1 }
 0x54b   : > { %1702 = vmatmul.msk.bf16.vlgmr.msra.gmra.mxu3 %vm851_vm2, %v1244_v43 }
 0x54d   : > { %v1046_v44 = vpop.f32.mrf.mxu0 }
 0x54e   : > { %v1049_v45 = vpack.c.bf16 %v1046_v44, %v1044_v40 }
 0x550   : > { %1696 = vmatmul.msk.bf16.vlgmr.msrb.gmra.mxu2 %vm896_vm3, %v1049_v45 }
 0x551   : > { %1329 = vmatpush.bf16.msrb.mxu2 %v1762_v58 }
 0x552   : > { %v1360_v21 = vpop.f32.mrf.mxu1 }
 0x555   : > { %v1163_v46 = vpop.f32.mrf.mxu0  ;;  %1330 = vmatpush.bf16.msrb.mxu2 %v1761_v60 }
 0x55d   : > { %v1165_v47 = vpop.f32.mrf.mxu0 }
 0x55e   : > { %v1168_v48 = vpack.c.bf16 %v1165_v47, %v1163_v46 }
 0x560   : > { %1700 = vmatmul.msk.bf16.vlgmr.msra.gmra.mxu2 %vm896_vm3, %v1168_v48 }
 0x5ce   : > { %v1263_v53 = vpop.f32.mrf.mxu3 }
 0x5d3   : > { %v1068_v57 = vpop.f32.mrf.mxu2 }
 0x5d4   : > { %v1089_v0 = vadd.f32 %v2696_v49, %v1068_v57  ;;  %v1766_v49 = vld [vmem:[%s2880_s27 + $0x18] sm:$0xff]  ;;  %s2167_s27 = scalar_lea.hbm %s2166_s11, 16 }
 0x5d5   : > { %1428 = vmatpush.bf16.msrb.mxu3 %v1766_v49  ;;  %p2168_p12 = scmp.ne.s32.totalorder %s2166_s11, %s2167_s27  ;;  %p2173_p5 = scmp.lt.s32.totalorder %s2171_s21, %s2167_s27 }
 0x5d6   : > { %v1265_v54 = vpop.f32.mrf.mxu3 }
 0x5d7   : > { %v1268_v55 = vpack.c.bf16 %v1265_v54, %v1263_v53  ;;  %p2169_p13 = pnand %p2168_p12, %p2542_p7  ;;  %p2174_p6 = por %p2173_p5, %p2172_p3 }
 0x5d9   : > { %1703 = vmatmul.msk.bf16.vlgmr.msrb.gmra.mxu0 %vm896_vm3, %v1268_v55  ;;  %p2170_p0 = pneg %p2169_p13 }
 0x5db   : > { %v1070_v61 = vpop.f32.mrf.mxu2  ;;  %p2175_p8 = pnand %p2174_p6, %p2170_p0 }
 0x5dc   : > { %v1091_v2 = vadd.f32 %v2698_v50, %v1070_v61  ;;  %v1765_v50 = vld [vmem:[%s2881_s13 + $0x10] sm:$0xff] }
 0x5dd   : > { %1429 = vmatpush.bf16.msrb.mxu3 %v1765_v50 }
 0x5e1   : > { %1430 = vmatpush.bf16.msrb.mxu3 %v1764_v12 }
 0x5e3   : > { %v1186_v62 = vpop.f32.mrf.mxu2 }
 0x5e4   : > { %v1191_v3 = vadd.f32 %v1186_v62, %v1089_v0 }
 0x5e5   : > { %1431 = vmatpush.bf16.msrb.mxu3 %v1763_v13 }
 0x5eb   : > { %v1188_v1 = vpop.f32.mrf.mxu2 }
 0x5ec   : > { %v1192_v4 = vadd.f32 %v1188_v1, %v1091_v2 }
 0x656   : > { %v1286_v63 = vpop.f32.mrf.mxu0 }
 0x657   : > { %v1291_v5 = vadd.f32 %v1286_v63, %v1191_v3 }
 0x659   : > { %v1297_v10 = vadd.f32 %v1934_v7, %v1291_v5 }
 0x65e   : > { %v1288_v8 = vpop.f32.mrf.mxu0 }
 0x65f   : > { %v1292_v9 = vadd.f32 %v1288_v8, %v1192_v4 }
 0x661   : > { %v1298_v11 = vadd.f32 %v1934_v7, %v1292_v9 }
 0x663   : > { %v1303_v35 = vpack.c.bf16 %v1298_v11, %v1297_v10 }
 0x665   : > { %1712 = vmatmul.msk.bf16.vlgmr.msrb.gmra.mxu2 %vm851_vm2, %v1303_v35 }
 0x6e8   : > { %v1332_v15 = vpop.f32.mrf.mxu2 }
 0x6e9   : > { %v1359_v16 = vadd.f32 %v1358_v14, %v1332_v15 }
 0x6eb   : > { %v1367_v18 = vadd.f32 %v1935_v17, %v1359_v16 }
 0x6ed   : > { %v1373_v22 = vmul.f32 %v1936_v19, %v1367_v18 }
 0x6ef   : > { %v1379_v26 = vadd.f32 %v1937_v23, %v1373_v22 }
 0x6f0   : > { %v1334_v20 = vpop.f32.mrf.mxu2 }
 0x6f1   : > { %v1361_v24 = vadd.f32 %v1360_v21, %v1334_v20  ;;  %v1381_v29 = vmax.f32 %v1379_v26, 0.0 }
 0x6f3   : > { %v1368_v25 = vadd.f32 %v1935_v17, %v1361_v24 }
 0x6f5   : > { %v1374_v27 = vmul.f32 %v1936_v19, %v1368_v25 }
 0x6f7   : > { %v1380_v28 = vadd.f32 %v1937_v23, %v1374_v27 }
 0x6f9   : > { %v1382_v30 = vmax.f32 %v1380_v28, 0.0 }
 0x6fb   : > { %v1383_v31 = vpack.c.bf16 %v1382_v30, %v1381_v29 }
 0x6fd   : > { %1738 = vmatmul.msk.bf16.vlgmr.msrb.gmra.mxu3 %vm1420_vm5, %v1383_v31 }
 0x780   : > { %v1433_v33 = vpop.f32.mrf.mxu3 }
 0x781   : > { %v1434_v34 = vadd.f32 %v1938_v32, %v1433_v33 }
 0x783   : > { %1438 = vst.msk [vmem:[%s2604_s12] sm:$0xff] %vm851_vm2, %v1434_v34 }
 0x788   : > { %v1435_v36 = vpop.f32.mrf.mxu3 }
 0x789   : > { %v1436_v37 = vadd.f32 %v1938_v32, %v1435_v36 }
 0x78b   : > { %1439 = vst.msk [vmem:[%s2604_s12 + $0x8] sm:$0xff] %vm851_vm2, %v1436_v37 }
 0x78c   : > { %2178 = shalt.err (!%p2175_p8)
}
 0x78d   : > { %s2297_s3 = smov 128   ;;  %s2298_s12 = smov 8  }
 0x78e   : > { %1793 = dma.vmem_to_hbm [thread:$0]  (%p2542_p7), %s1456_s14, 256, %s1458_s19, %s1441_s30, %s2297_s3, %s2297_s3, %s2298_s12  }
 0x78f PF: > { %p1830_p9 = scmp.ge.s32.totalorder %s2285_s1, 2  ;;  %s1472_s22 = sand.u32 1, %s2245_s24  }
 0x790   : > { %s1473_s16 = scalar_lea.sflag [#allocation6], %s1472_s22 }
 0x791   : > { %p1816_p2 = pnand %p1830_p9, %p2555_p10 }
 0x793   : > { %p1817_p4 = pneg %p1816_p2 }
 0x795   : > { %2240 = dma.done.wait (%p1817_p4), %s1473_s16, 256  }
 0x796   : > { %2242 = vsyncadd (%p1817_p4), %s1473_s16, 4294967040  ;;  %s36_s1 = sadd.s32 1, %s2285_s1   ;;  %s2887_s30 = sld [smem:[#allocation21_spill]] }
 0x797   : > { %p33_p11 = scmp.ge.s32.totalorder %s36_s1, 6   ;;  %s2888_s5 = sld [smem:[#allocation22_spill]] }
 0x798   : > { %s2889_s19 = sld [smem:[#allocation23_spill]]  ;;  %s2890_s24 = smov %s2249_s25 }
 0x799   : > { %s2891_s25 = smov %s2253_s26  ;;  %s2892_s26 = smov %s2550_s17 }
 0x79a   : > { %s2893_s27 = smov %s2261_s28  ;;  %s2894_s28 = smov %s2265_s29 }
 0x79b   : > { %s2895_s29 = smov %s2547_s8  ;;  %s2896_s0 = smov %s2277_s18 }
 0x79c   :  { %35 = sbr.rel (!%p33_p11) target bundleno = 31 (0x1f), region = 163 }
 0x79d   : > { %s2897_s18 = smov %s2888_s5 }
 0x7a1   :  { %1479 = vsyncpa [#allocation5], 1 }
 0x7a2   :  { %1481 = vsyncpa [#allocation5 + $0x1], 1 }
 0x7a3   :  { %1482 = vsyncpa [#allocation8], 1 }
 0x7a4   :  { %1483 = vsyncpa [#allocation11], 1 }
 0x7a5   :  { %1484 = vsyncpa [#allocation14], 1 }
 0x7a6   :  { %1485 = vsyncpa [#allocation6], 1 }
 0x7a7   :  { %1487 = vsyncpa [#allocation6 + $0x1], 1 }

</bundles_post_ra>
